<compile_context>
chip_gen: v6e
topology: v6e:2x2x1
jax: 0.10.0
libtpu: 0.0.40
codegen_flags: <defaults>
</compile_context>

<pallas_src>
import jax
import jax.numpy as jnp
from jax import lax
from jax.experimental import pallas as pl
from jax.experimental.pallas import tpu as pltpu

LEAK = 0.1
BN_EPS = 1e-5


def _leaky(x):
    return jnp.where(x >= 0, x, LEAK * x)


def _cdiv(a, b):
    return -(-a // b)


# ---------------------------------------------------------------------------
# Weight repacking (done once, outside the kernel, in plain XLA).
#  - conv1: block-diagonal (W*Cin, W*Cm) over the fused (w, c) lane axis.
#  - conv2: per-kd weight (3*W*Cm, W*Co): kh taps are folded into K (the lane
#    groups of the expanded intermediate), kw taps are a block-tridiagonal
#    layout over w (zero-pad at the w boundary comes for free).
#  - BN scale / bias are NOT folded into the bf16 weights; they are returned
#    as f32 row vectors tiled over w for the epilogue.
# ---------------------------------------------------------------------------
def _pack_params(params, W):
    w1 = params["w1"]                       # (Cin, Cm)
    w2 = params["w2_dhwio"]                 # (3, 3, 3, Cm, Co)
    Cin, Cm = w1.shape
    Co = w2.shape[-1]
    WCm, WCo = W * Cm, W * Co

    # block-diagonal pointwise weight over the fused (w, c) lane axis
    w1_big = jnp.kron(jnp.eye(W, dtype=w1.dtype), w1)          # (W*Cin, W*Cm)

    # per-kd, kh folded into K, block-tridiagonal over w
    w2_big = jnp.zeros((3, 3 * WCm, WCo), w2.dtype)
    for kh in range(3):
        for kw in range(3):
            for w in range(W):
                wi = w + kw - 1
                if 0 <= wi < W:
                    w2_big = w2_big.at[
                        :, kh * WCm + wi * Cm:kh * WCm + (wi + 1) * Cm,
                        w * Co:(w + 1) * Co].set(w2[:, kh, kw])

    def tile_row(v, c):
        return jnp.tile(v.reshape(-1), W).reshape(1, W * c).astype(jnp.float32)

    s1_t = tile_row(params["scale1"], Cm)
    b1_t = tile_row(params["bias1"], Cm)
    s2_t = tile_row(params["scale2"], Co)
    b2_t = tile_row(params["bias2"], Co)
    return (w1_big.astype(jnp.bfloat16), s1_t, b1_t,
            w2_big.astype(jnp.bfloat16), s2_t, b2_t)


# ---------------------------------------------------------------------------
# Wrapper + fused kernel
# ---------------------------------------------------------------------------
def basic_block_forward(x_ncdhw, params, *, td=None):
    N, Cin, D, H, W = x_ncdhw.shape
    Cm = params["w1"].shape[1]
    Co = params["w2_dhwio"].shape[-1]
    assert Co == Cin, "residual add requires planes[1] == inplanes"

    WCin, WCm, WCo = W * Cin, W * Cm, W * Co
    K3 = 3 * WCm                            # stage-3 matmul depth (kh folded)

    # depth tile: target M = td*H ~= 128 rows per matmul, pad D if needed
    if td is None:
        td = _cdiv(128, H)
    td = max(1, min(td, D))
    DT = _cdiv(D, td)
    D_pad = DT * td

    w1_big, s1_t, b1_t, w2_big, s2_t, b2_t = _pack_params(params, W)

    # NCDHW -> NDHWC with (w, c) fused into the lane axis
    x_f = jnp.transpose(x_ncdhw, (0, 2, 3, 4, 1)).reshape(N, D, H, WCin)
    if D_pad != D:
        x_f = jnp.pad(x_f, ((0, 0), (0, D_pad - D), (0, 0), (0, 0)))

    # -------------------------- kernel body --------------------------------
    def kernel(x_ref, xlo_ref, xhi_ref, w1_ref, s1_ref, b1_ref,
               w2_ref, s2_ref, b2_ref, o_ref, e_ref):
        # x_ref:   (1, td, H, WCin)  main depth slab (also the residual)
        # xlo/xhi: (1, 1,  H, WCin)  depth halo rows (clamped indices)
        # w1_ref:  (WCin, WCm) bf16, s1/b1: (1, WCm) f32
        # w2_ref:  (3, 3*WCm, WCo) bf16, s2/b2: (1, WCo) f32
        # o_ref:   (1, td, H, WCo)
        # e_ref:   ((td+2)*H, 3*WCm) f32 scratch: kh-expanded intermediate
        di = pl.program_id(1)

        def conv1(x2d):                     # (R, WCin) -> (R, WCm) f32
            y = jnp.dot(x2d.astype(jnp.bfloat16), w1_ref[...],
                        preferred_element_type=jnp.float32)
            return _leaky(y * s1_ref[...] + b1_ref[...])

        def expand(y):                      # (R, WCm) -> (R, 3*WCm) f32
            # lanes [0:WCm]      = y at h-1 (zero at h == 0)
            # lanes [WCm:2WCm]   = y
            # lanes [2WCm:3WCm]  = y at h+1 (zero at h == H-1)
            R = y.shape[0]
            h_idx = lax.broadcasted_iota(jnp.int32, (R, 1), 0) % H
            y_m = jnp.where(h_idx > 0, pltpu.roll(y, shift=1, axis=0), 0.0)
            y_p = jnp.where(h_idx < H - 1,
                            pltpu.roll(y, shift=R - 1, axis=0), 0.0)
            return jnp.concatenate([y_m, y, y_p], axis=-1)

        # ---- stage 1: 1x1x1 conv + BN1 + LeakyReLU (main slab) -------------
        y1 = conv1(x_ref[0].reshape(td * H, WCin))
        if D_pad != D:      # static: only compiled in when depth was padded
            row = lax.broadcasted_iota(jnp.int32, (td * H, 1), 0)
            y1 = jnp.where(row // H + di * td < D, y1, 0.0)
        e_ref[H:(td + 1) * H, :] = expand(y1)

        # ---- depth-halo rows: compute when inside the volume, else zero ----
        zrow = jnp.zeros((H, K3), jnp.float32)

        @pl.when(di == 0)
        def _():
            e_ref[0:H, :] = zrow

        @pl.when(di > 0)
        def _():
            e_ref[0:H, :] = expand(conv1(xlo_ref[0, 0]))

        hi_ok = (di * td + td) < D

        @pl.when(jnp.logical_not(hi_ok))
        def _():
            e_ref[(td + 1) * H:(td + 2) * H, :] = zrow

        @pl.when(hi_ok)
        def _():
            e_ref[(td + 1) * H:(td + 2) * H, :] = expand(conv1(xhi_ref[0, 0]))

        # ---- stage 2: 3x3x3 conv as 3 deep matmuls (kh & kw folded in K) ---
        acc = jnp.zeros((td * H, WCo), jnp.float32)
        for kd in range(3):
            lhs = e_ref[kd * H:kd * H + td * H, :].astype(jnp.bfloat16)
            acc = acc + jnp.dot(lhs, w2_ref[kd],
                                preferred_element_type=jnp.float32)

        # ---- stage 3: BN2 + residual + LeakyReLU ----------------------------
        res = x_ref[0].reshape(td * H, WCo)
        y = acc * s2_ref[...] + b2_ref[...] + res
        o_ref[...] = _leaky(y).reshape(1, td, H, WCo).astype(o_ref.dtype)

    # ------------------------ VMEM budget / call ----------------------------
    step_bytes = (2 * (td * H * WCin * 4 + 2 * H * WCin * 4 + td * H * WCo * 4)
                  + 2 * (WCin * WCm * 2 + 3 * K3 * WCo * 2 + 4 * 128 * 4)
                  + (td + 2) * H * K3 * 4)
    vmem_limit = int(min(max(2 * step_bytes, 32 << 20), 64 << 20))

    out_f = pl.pallas_call(
        kernel,
        out_shape=jax.ShapeDtypeStruct((N, D_pad, H, WCo), jnp.float32),
        grid_spec=pltpu.PrefetchScalarGridSpec(
            num_scalar_prefetch=0,
            grid=(N, DT),
            in_specs=[
                # main slab (also the residual)
                pl.BlockSpec((1, td, H, WCin), lambda n, d: (n, d, 0, 0)),
                # depth-halo rows (clamped; zeroed in-kernel at volume ends)
                pl.BlockSpec((1, 1, H, WCin),
                             lambda n, d: (n, jnp.maximum(d * td - 1, 0), 0, 0)),
                pl.BlockSpec((1, 1, H, WCin),
                             lambda n, d: (n, jnp.minimum(d * td + td, D_pad - 1),
                                           0, 0)),
                # repacked weights / per-channel scale & bias (VMEM resident)
                pl.BlockSpec((WCin, WCm), lambda n, d: (0, 0)),
                pl.BlockSpec((1, WCm), lambda n, d: (0, 0)),
                pl.BlockSpec((1, WCm), lambda n, d: (0, 0)),
                pl.BlockSpec((3, K3, WCo), lambda n, d: (0, 0, 0)),
                pl.BlockSpec((1, WCo), lambda n, d: (0, 0)),
                pl.BlockSpec((1, WCo), lambda n, d: (0, 0)),
            ],
            out_specs=pl.BlockSpec((1, td, H, WCo), lambda n, d: (n, d, 0, 0)),
            scratch_shapes=[pltpu.VMEM(((td + 2) * H, K3), jnp.float32)],
        ),
        compiler_params=pltpu.CompilerParams(
            dimension_semantics=("parallel", "parallel"),
            vmem_limit_bytes=vmem_limit),
    )(x_f, x_f, x_f, w1_big, s1_t, b1_t, w2_big, s2_t, b2_t)

    if D_pad != D:
        out_f = out_f[:, :D]
    out = out_f.reshape(N, D, H, W, Co)
    return jnp.transpose(out, (0, 4, 1, 2, 3))           # back to NCDHW


# ---------------------------------------------------------------------------
# Deterministic parameter init (shapes from BasicBlock.__init__)
# ---------------------------------------------------------------------------
def init_params(key, inplanes, planes):
    cm, co = planes
    ks = jax.random.split(key, 10)

    # PyTorch conv weights: conv1 (cm, inplanes, 1,1,1), conv2 (co, cm, 3,3,3)
    w1_pt = 0.1 * jax.random.normal(ks[0], (cm, inplanes, 1, 1, 1), jnp.float32)
    w2_pt = 0.1 * jax.random.normal(ks[1], (co, cm, 3, 3, 3), jnp.float32)

    # BatchNorm params (eval-mode folding)
    g1 = 1.0 + 0.1 * jax.random.normal(ks[2], (cm,), jnp.float32)
    beta1 = 0.1 * jax.random.normal(ks[3], (cm,), jnp.float32)
    mean1 = 0.1 * jax.random.normal(ks[4], (cm,), jnp.float32)
    var1 = 0.5 + jnp.abs(jax.random.normal(ks[5], (cm,), jnp.float32))
    g2 = 1.0 + 0.1 * jax.random.normal(ks[6], (co,), jnp.float32)
    beta2 = 0.1 * jax.random.normal(ks[7], (co,), jnp.float32)
    mean2 = 0.1 * jax.random.normal(ks[8], (co,), jnp.float32)
    var2 = 0.5 + jnp.abs(jax.random.normal(ks[9], (co,), jnp.float32))

    scale1 = g1 / jnp.sqrt(var1 + BN_EPS)
    bias1 = beta1 - mean1 * scale1
    scale2 = g2 / jnp.sqrt(var2 + BN_EPS)
    bias2 = beta2 - mean2 * scale2

    w1_dhwio = jnp.transpose(w1_pt, (2, 3, 4, 1, 0))      # (1,1,1,Cin,Cm)
    w2_dhwio = jnp.transpose(w2_pt, (2, 3, 4, 1, 0))      # (3,3,3,Cm,Co)

    return {
        "w1": w1_dhwio.reshape(inplanes, cm),
        "w1_dhwio": w1_dhwio,
        "w2_dhwio": w2_dhwio,
        "scale1": scale1.reshape(1, cm),
        "bias1": bias1.reshape(1, cm),
        "scale2": scale2.reshape(1, co),
        "bias2": bias2.reshape(1, co),
    }


# Pure-JAX reference (same eval-mode BN folding) for a sanity check.
def ref_forward(x_ncdhw, p):
    dn = ("NDHWC", "DHWIO", "NDHWC")
    x = jnp.transpose(x_ncdhw, (0, 2, 3, 4, 1))
    y = lax.conv_general_dilated(x, p["w1_dhwio"], (1, 1, 1), "VALID",
                                 dimension_numbers=dn)
    y = _leaky(y * p["scale1"][0] + p["bias1"][0])
    y = lax.conv_general_dilated(y, p["w2_dhwio"], (1, 1, 1), "SAME",
                                 dimension_numbers=dn)
    y = _leaky(y * p["scale2"][0] + p["bias2"][0] + x)
    return jnp.transpose(y, (0, 4, 1, 2, 3))


if __name__ == "__main__":
    key = jax.random.PRNGKey(0)
    k_x, k_p = jax.random.split(key)

    inplanes = 16
    planes = (8, 16)              # darknet style: (inplanes//2, inplanes)
    N, D, H, W = 2, 8, 8, 8

    x = jax.random.normal(k_x, (N, inplanes, D, H, W), jnp.float32)
    params = init_params(k_p, inplanes, planes)

    fwd = jax.jit(lambda xx: basic_block_forward(xx, params))
    out = jax.block_until_ready(fwd(x))

    ref = ref_forward(x, params)
    assert out.shape == x.shape
    max_err = float(jnp.max(jnp.abs(out - ref)))
    assert jnp.allclose(out, ref, atol=2e-2, rtol=2e-2), max_err

    print("KERNEL_OK")
</pallas_src>

<mosaic_0001>
module attributes {stable_mosaic.version = 11 : i64} {
  func.func @kernel(%arg0: i32, %arg1: i32, %arg2: memref<1x8x8x128xf32, #tpu.memory_space<vmem>>, %arg3: memref<1x1x8x128xf32, #tpu.memory_space<vmem>>, %arg4: memref<1x1x8x128xf32, #tpu.memory_space<vmem>>, %arg5: memref<128x64xbf16, #tpu.memory_space<vmem>>, %arg6: memref<1x64xf32, #tpu.memory_space<vmem>>, %arg7: memref<1x64xf32, #tpu.memory_space<vmem>>, %arg8: memref<3x192x128xbf16, #tpu.memory_space<vmem>>, %arg9: memref<1x128xf32, #tpu.memory_space<vmem>>, %arg10: memref<1x128xf32, #tpu.memory_space<vmem>>, %arg11: memref<1x8x8x128xf32, #tpu.memory_space<vmem>>, %arg12: memref<80x192xf32, #tpu.memory_space<vmem>>) attributes {dimension_semantics = [#tpu.dimension_semantics<parallel>, #tpu.dimension_semantics<parallel>], iteration_bounds = array<i64: 2, 1>, scalar_prefetch = 0 : i64, scratch_operands = 1 : i64, tpu.core_type = #tpu.core_type<tc>, window_params = [{transform_indices = @transform_0, window_bounds = array<i64: 1, 8, 8, 128>}, {transform_indices = @transform_1, window_bounds = array<i64: 1, 1, 8, 128>}, {transform_indices = @transform_2, window_bounds = array<i64: 1, 1, 8, 128>}, {pipeline_mode = #tpu.pipeline_mode<synchronous>, transform_indices = @transform_3, window_bounds = array<i64: 128, 64>}, {pipeline_mode = #tpu.pipeline_mode<synchronous>, transform_indices = @transform_4, window_bounds = array<i64: 1, 64>}, {pipeline_mode = #tpu.pipeline_mode<synchronous>, transform_indices = @transform_5, window_bounds = array<i64: 1, 64>}, {pipeline_mode = #tpu.pipeline_mode<synchronous>, transform_indices = @transform_6, window_bounds = array<i64: 3, 192, 128>}, {pipeline_mode = #tpu.pipeline_mode<synchronous>, transform_indices = @transform_7, window_bounds = array<i64: 1, 128>}, {pipeline_mode = #tpu.pipeline_mode<synchronous>, transform_indices = @transform_8, window_bounds = array<i64: 1, 128>}, {transform_indices = @transform_9, window_bounds = array<i64: 1, 8, 8, 128>}]} {
    %c0 = arith.constant 0 : index
    %c0_0 = arith.constant 0 : index
    %c0_1 = arith.constant 0 : index
    %c0_2 = arith.constant 0 : index
    %0 = vector.load %arg2[%c0, %c0_0, %c0_1, %c0_2] : memref<1x8x8x128xf32, #tpu.memory_space<vmem>>, vector<1x8x8x128xf32>
    %1 = vector.shape_cast %0 : vector<1x8x8x128xf32> to vector<8x8x128xf32>
    %2 = vector.shape_cast %1 : vector<8x8x128xf32> to vector<64x128xf32>
    %3 = arith.truncf %2 : vector<64x128xf32> to vector<64x128xbf16>
    %c0_3 = arith.constant 0 : index
    %c0_4 = arith.constant 0 : index
    %4 = vector.load %arg5[%c0_3, %c0_4] : memref<128x64xbf16, #tpu.memory_space<vmem>>, vector<128x64xbf16>
    %cst = arith.constant dense<0.000000e+00> : vector<64x64xf32>
    %5 = tpu.matmul %3, %4, %cst {dimension_numbers = #tpu.dot_dimension_numbers<[1], [0], [0], [1], [0, 0, 1, 1], [], []>} : vector<64x128xbf16>, vector<128x64xbf16>, vector<64x64xf32> -> vector<64x64xf32>
    %c0_5 = arith.constant 0 : index
    %c0_6 = arith.constant 0 : index
    %6 = vector.load %arg6[%c0_5, %c0_6] : memref<1x64xf32, #tpu.memory_space<vmem>>, vector<1x64xf32>
    %7 = vector.broadcast %6 : vector<1x64xf32> to vector<64x64xf32>
    %8 = arith.mulf %5, %7 : vector<64x64xf32>
    %c0_7 = arith.constant 0 : index
    %c0_8 = arith.constant 0 : index
    %9 = vector.load %arg7[%c0_7, %c0_8] : memref<1x64xf32, #tpu.memory_space<vmem>>, vector<1x64xf32>
    %10 = vector.broadcast %9 : vector<1x64xf32> to vector<64x64xf32>
    %11 = arith.addf %8, %10 : vector<64x64xf32>
    %cst_9 = arith.constant 0.000000e+00 : f32
    %12 = vector.broadcast %cst_9 : f32 to vector<64x64xf32>
    %13 = arith.cmpf oge, %11, %12 : vector<64x64xf32>
    %cst_10 = arith.constant 1.000000e-01 : f32
    %14 = vector.broadcast %cst_10 : f32 to vector<64x64xf32>
    %15 = arith.mulf %14, %11 : vector<64x64xf32>
    %16 = arith.select %13, %11, %15 : vector<64x64xi1>, vector<64x64xf32>
    %17 = tpu.iota {dimensions = array<i32: 0>} : vector<64x1xi32>
    %c8_i32 = arith.constant 8 : i32
    %c0_i32 = arith.constant 0 : i32
    %18 = arith.cmpi eq, %c8_i32, %c0_i32 : i32
    %c1_i32 = arith.constant 1 : i32
    %19 = arith.select %18, %c1_i32, %c8_i32 : i32
    %20 = vector.broadcast %19 : i32 to vector<64x1xi32>
    %21 = arith.remsi %17, %20 : vector<64x1xi32>
    %c0_i32_11 = arith.constant 0 : i32
    %22 = vector.broadcast %c0_i32_11 : i32 to vector<64x1xi32>
    %23 = arith.cmpi ne, %21, %22 : vector<64x1xi32>
    %c0_i32_12 = arith.constant 0 : i32
    %24 = vector.broadcast %c0_i32_12 : i32 to vector<64x1xi32>
    %25 = arith.cmpi slt, %21, %24 : vector<64x1xi32>
    %c0_i32_13 = arith.constant 0 : i32
    %26 = arith.cmpi slt, %19, %c0_i32_13 : i32
    %27 = vector.broadcast %26 : i1 to vector<64x1xi1>
    %28 = vector.broadcast %27 : vector<64x1xi1> to vector<64x1xi1>
    %29 = arith.xori %25, %28 : vector<64x1xi1>
    %30 = arith.andi %29, %23 : vector<64x1xi1>
    %31 = vector.broadcast %19 : i32 to vector<64x1xi32>
    %32 = arith.addi %21, %31 : vector<64x1xi32>
    %33 = arith.select %30, %32, %21 : vector<64x1xi1>, vector<64x1xi32>
    %c0_i32_14 = arith.constant 0 : i32
    %34 = vector.broadcast %c0_i32_14 : i32 to vector<64x1xi32>
    %35 = arith.cmpi sgt, %33, %34 : vector<64x1xi32>
    %c1_i32_15 = arith.constant 1 : i32
    %36 = tpu.dynamic_rotate %16 by %c1_i32_15 dim 0 : vector<64x64xf32>, i32 -> vector<64x64xf32>
    %cst_16 = arith.constant 0.000000e+00 : f32
    %37 = vector.shape_cast %35 : vector<64x1xi1> to vector<64x1xi1>
    %38 = vector.broadcast %37 : vector<64x1xi1> to vector<64x64xi1>
    %39 = vector.broadcast %cst_16 : f32 to vector<64x64xf32>
    %40 = arith.select %38, %36, %39 : vector<64x64xi1>, vector<64x64xf32>
    %c7_i32 = arith.constant 7 : i32
    %41 = vector.broadcast %c7_i32 : i32 to vector<64x1xi32>
    %42 = arith.cmpi slt, %33, %41 : vector<64x1xi32>
    %c63_i32 = arith.constant 63 : i32
    %43 = tpu.dynamic_rotate %16 by %c63_i32 dim 0 : vector<64x64xf32>, i32 -> vector<64x64xf32>
    %cst_17 = arith.constant 0.000000e+00 : f32
    %44 = vector.shape_cast %42 : vector<64x1xi1> to vector<64x1xi1>
    %45 = vector.broadcast %44 : vector<64x1xi1> to vector<64x64xi1>
    %46 = vector.broadcast %cst_17 : f32 to vector<64x64xf32>
    %47 = arith.select %45, %43, %46 : vector<64x64xi1>, vector<64x64xf32>
    %48 = tpu.concatenate %40, %16, %47 in 1 : vector<64x64xf32>, vector<64x64xf32>, vector<64x64xf32> -> vector<64x192xf32>
    %c8 = arith.constant 8 : index
    %c0_18 = arith.constant 0 : index
    %49 = vector.load %arg12[%c8, %c0_18] : memref<80x192xf32, #tpu.memory_space<vmem>>, vector<64x192xf32>
    tpu.vector_store %arg12[%c8, %c0_18], %48 {strides = array<i32>} : memref<80x192xf32, #tpu.memory_space<vmem>>, vector<64x192xf32>,
    %cst_19 = arith.constant 0.000000e+00 : f32
    %50 = vector.broadcast %cst_19 : f32 to vector<8x192xf32>
    %c0_i32_20 = arith.constant 0 : i32
    %51 = arith.cmpi eq, %arg1, %c0_i32_20 : i32
    %52 = arith.extui %51 : i1 to i32
    %c0_i32_21 = arith.constant 0 : i32
    %53 = arith.cmpi ne, %52, %c0_i32_21 : i32
    scf.if %53 {
      %c0_59 = arith.constant 0 : index
      %c0_60 = arith.constant 0 : index
      %101 = vector.load %arg12[%c0_59, %c0_60] : memref<80x192xf32, #tpu.memory_space<vmem>>, vector<8x192xf32>
      tpu.vector_store %arg12[%c0_59, %c0_60], %50 {strides = array<i32>} : memref<80x192xf32, #tpu.memory_space<vmem>>, vector<8x192xf32>,
    } else {
    }
    %c0_i32_22 = arith.constant 0 : i32
    %54 = arith.cmpi sgt, %arg1, %c0_i32_22 : i32
    %55 = arith.extui %54 : i1 to i32
    %c0_i32_23 = arith.constant 0 : i32
    %56 = arith.cmpi ne, %55, %c0_i32_23 : i32
    scf.if %56 {
      %c0_59 = arith.constant 0 : index
      %c0_60 = arith.constant 0 : index
      %c0_61 = arith.constant 0 : index
      %c0_62 = arith.constant 0 : index
      %101 = vector.load %arg3[%c0_59, %c0_60, %c0_61, %c0_62] : memref<1x1x8x128xf32, #tpu.memory_space<vmem>>, vector<1x1x8x128xf32>
      %102 = vector.shape_cast %101 : vector<1x1x8x128xf32> to vector<8x128xf32>
      %103 = arith.truncf %102 : vector<8x128xf32> to vector<8x128xbf16>
      %c0_63 = arith.constant 0 : index
      %c0_64 = arith.constant 0 : index
      %104 = vector.load %arg5[%c0_63, %c0_64] : memref<128x64xbf16, #tpu.memory_space<vmem>>, vector<128x64xbf16>
      %cst_65 = arith.constant dense<0.000000e+00> : vector<8x64xf32>
      %105 = tpu.matmul %103, %104, %cst_65 {dimension_numbers = #tpu.dot_dimension_numbers<[1], [0], [0], [1], [0, 0, 1, 1], [], []>} : vector<8x128xbf16>, vector<128x64xbf16>, vector<8x64xf32> -> vector<8x64xf32>
      %c0_66 = arith.constant 0 : index
      %c0_67 = arith.constant 0 : index
      %106 = vector.load %arg6[%c0_66, %c0_67] : memref<1x64xf32, #tpu.memory_space<vmem>>, vector<1x64xf32>
      %107 = vector.broadcast %106 : vector<1x64xf32> to vector<8x64xf32>
      %108 = arith.mulf %105, %107 : vector<8x64xf32>
      %c0_68 = arith.constant 0 : index
      %c0_69 = arith.constant 0 : index
      %109 = vector.load %arg7[%c0_68, %c0_69] : memref<1x64xf32, #tpu.memory_space<vmem>>, vector<1x64xf32>
      %110 = vector.broadcast %109 : vector<1x64xf32> to vector<8x64xf32>
      %111 = arith.addf %108, %110 : vector<8x64xf32>
      %cst_70 = arith.constant 0.000000e+00 : f32
      %112 = vector.broadcast %cst_70 : f32 to vector<8x64xf32>
      %113 = arith.cmpf oge, %111, %112 : vector<8x64xf32>
      %cst_71 = arith.constant 1.000000e-01 : f32
      %114 = vector.broadcast %cst_71 : f32 to vector<8x64xf32>
      %115 = arith.mulf %114, %111 : vector<8x64xf32>
      %116 = arith.select %113, %111, %115 : vector<8x64xi1>, vector<8x64xf32>
      %117 = tpu.iota {dimensions = array<i32: 0>} : vector<8x1xi32>
      %c8_i32_72 = arith.constant 8 : i32
      %c0_i32_73 = arith.constant 0 : i32
      %118 = arith.cmpi eq, %c8_i32_72, %c0_i32_73 : i32
      %c1_i32_74 = arith.constant 1 : i32
      %119 = arith.select %118, %c1_i32_74, %c8_i32_72 : i32
      %120 = vector.broadcast %119 : i32 to vector<8x1xi32>
      %121 = arith.remsi %117, %120 : vector<8x1xi32>
      %c0_i32_75 = arith.constant 0 : i32
      %122 = vector.broadcast %c0_i32_75 : i32 to vector<8x1xi32>
      %123 = arith.cmpi ne, %121, %122 : vector<8x1xi32>
      %c0_i32_76 = arith.constant 0 : i32
      %124 = vector.broadcast %c0_i32_76 : i32 to vector<8x1xi32>
      %125 = arith.cmpi slt, %121, %124 : vector<8x1xi32>
      %c0_i32_77 = arith.constant 0 : i32
      %126 = arith.cmpi slt, %119, %c0_i32_77 : i32
      %127 = vector.broadcast %126 : i1 to vector<8x1xi1>
      %128 = vector.broadcast %127 : vector<8x1xi1> to vector<8x1xi1>
      %129 = arith.xori %125, %128 : vector<8x1xi1>
      %130 = arith.andi %129, %123 : vector<8x1xi1>
      %131 = vector.broadcast %119 : i32 to vector<8x1xi32>
      %132 = arith.addi %121, %131 : vector<8x1xi32>
      %133 = arith.select %130, %132, %121 : vector<8x1xi1>, vector<8x1xi32>
      %c0_i32_78 = arith.constant 0 : i32
      %134 = vector.broadcast %c0_i32_78 : i32 to vector<8x1xi32>
      %135 = arith.cmpi sgt, %133, %134 : vector<8x1xi32>
      %c1_i32_79 = arith.constant 1 : i32
      %136 = tpu.dynamic_rotate %116 by %c1_i32_79 dim 0 : vector<8x64xf32>, i32 -> vector<8x64xf32>
      %cst_80 = arith.constant 0.000000e+00 : f32
      %137 = vector.shape_cast %135 : vector<8x1xi1> to vector<8x1xi1>
      %138 = vector.broadcast %137 : vector<8x1xi1> to vector<8x64xi1>
      %139 = vector.broadcast %cst_80 : f32 to vector<8x64xf32>
      %140 = arith.select %138, %136, %139 : vector<8x64xi1>, vector<8x64xf32>
      %c7_i32_81 = arith.constant 7 : i32
      %141 = vector.broadcast %c7_i32_81 : i32 to vector<8x1xi32>
      %142 = arith.cmpi slt, %133, %141 : vector<8x1xi32>
      %c7_i32_82 = arith.constant 7 : i32
      %143 = tpu.dynamic_rotate %116 by %c7_i32_82 dim 0 : vector<8x64xf32>, i32 -> vector<8x64xf32>
      %cst_83 = arith.constant 0.000000e+00 : f32
      %144 = vector.shape_cast %142 : vector<8x1xi1> to vector<8x1xi1>
      %145 = vector.broadcast %144 : vector<8x1xi1> to vector<8x64xi1>
      %146 = vector.broadcast %cst_83 : f32 to vector<8x64xf32>
      %147 = arith.select %145, %143, %146 : vector<8x64xi1>, vector<8x64xf32>
      %148 = tpu.concatenate %140, %116, %147 in 1 : vector<8x64xf32>, vector<8x64xf32>, vector<8x64xf32> -> vector<8x192xf32>
      %c0_84 = arith.constant 0 : index
      %c0_85 = arith.constant 0 : index
      %149 = vector.load %arg12[%c0_84, %c0_85] : memref<80x192xf32, #tpu.memory_space<vmem>>, vector<8x192xf32>
      tpu.vector_store %arg12[%c0_84, %c0_85], %148 {strides = array<i32>} : memref<80x192xf32, #tpu.memory_space<vmem>>, vector<8x192xf32>,
    } else {
    }
    %c8_i32_24 = arith.constant 8 : i32
    %57 = arith.muli %arg1, %c8_i32_24 : i32
    %c8_i32_25 = arith.constant 8 : i32
    %58 = arith.addi %57, %c8_i32_25 : i32
    %c8_i32_26 = arith.constant 8 : i32
    %59 = arith.cmpi slt, %58, %c8_i32_26 : i32
    %true = arith.constant true
    %60 = arith.xori %59, %true : i1
    %61 = arith.extui %60 : i1 to i32
    %c0_i32_27 = arith.constant 0 : i32
    %62 = arith.cmpi ne, %61, %c0_i32_27 : i32
    scf.if %62 {
      %c72 = arith.constant 72 : index
      %c0_59 = arith.constant 0 : index
      %101 = vector.load %arg12[%c72, %c0_59] : memref<80x192xf32, #tpu.memory_space<vmem>>, vector<8x192xf32>
      tpu.vector_store %arg12[%c72, %c0_59], %50 {strides = array<i32>} : memref<80x192xf32, #tpu.memory_space<vmem>>, vector<8x192xf32>,
    } else {
    }
    %63 = arith.extui %59 : i1 to i32
    %c0_i32_28 = arith.constant 0 : i32
    %64 = arith.cmpi ne, %63, %c0_i32_28 : i32
    scf.if %64 {
      %c0_59 = arith.constant 0 : index
      %c0_60 = arith.constant 0 : index
      %c0_61 = arith.constant 0 : index
      %c0_62 = arith.constant 0 : index
      %101 = vector.load %arg4[%c0_59, %c0_60, %c0_61, %c0_62] : memref<1x1x8x128xf32, #tpu.memory_space<vmem>>, vector<1x1x8x128xf32>
      %102 = vector.shape_cast %101 : vector<1x1x8x128xf32> to vector<8x128xf32>
      %103 = arith.truncf %102 : vector<8x128xf32> to vector<8x128xbf16>
      %c0_63 = arith.constant 0 : index
      %c0_64 = arith.constant 0 : index
      %104 = vector.load %arg5[%c0_63, %c0_64] : memref<128x64xbf16, #tpu.memory_space<vmem>>, vector<128x64xbf16>
      %cst_65 = arith.constant dense<0.000000e+00> : vector<8x64xf32>
      %105 = tpu.matmul %103, %104, %cst_65 {dimension_numbers = #tpu.dot_dimension_numbers<[1], [0], [0], [1], [0, 0, 1, 1], [], []>} : vector<8x128xbf16>, vector<128x64xbf16>, vector<8x64xf32> -> vector<8x64xf32>
      %c0_66 = arith.constant 0 : index
      %c0_67 = arith.constant 0 : index
      %106 = vector.load %arg6[%c0_66, %c0_67] : memref<1x64xf32, #tpu.memory_space<vmem>>, vector<1x64xf32>
      %107 = vector.broadcast %106 : vector<1x64xf32> to vector<8x64xf32>
      %108 = arith.mulf %105, %107 : vector<8x64xf32>
      %c0_68 = arith.constant 0 : index
      %c0_69 = arith.constant 0 : index
      %109 = vector.load %arg7[%c0_68, %c0_69] : memref<1x64xf32, #tpu.memory_space<vmem>>, vector<1x64xf32>
      %110 = vector.broadcast %109 : vector<1x64xf32> to vector<8x64xf32>
      %111 = arith.addf %108, %110 : vector<8x64xf32>
      %cst_70 = arith.constant 0.000000e+00 : f32
      %112 = vector.broadcast %cst_70 : f32 to vector<8x64xf32>
      %113 = arith.cmpf oge, %111, %112 : vector<8x64xf32>
      %cst_71 = arith.constant 1.000000e-01 : f32
      %114 = vector.broadcast %cst_71 : f32 to vector<8x64xf32>
      %115 = arith.mulf %114, %111 : vector<8x64xf32>
      %116 = arith.select %113, %111, %115 : vector<8x64xi1>, vector<8x64xf32>
      %117 = tpu.iota {dimensions = array<i32: 0>} : vector<8x1xi32>
      %c8_i32_72 = arith.constant 8 : i32
      %c0_i32_73 = arith.constant 0 : i32
      %118 = arith.cmpi eq, %c8_i32_72, %c0_i32_73 : i32
      %c1_i32_74 = arith.constant 1 : i32
      %119 = arith.select %118, %c1_i32_74, %c8_i32_72 : i32
      %120 = vector.broadcast %119 : i32 to vector<8x1xi32>
      %121 = arith.remsi %117, %120 : vector<8x1xi32>
      %c0_i32_75 = arith.constant 0 : i32
      %122 = vector.broadcast %c0_i32_75 : i32 to vector<8x1xi32>
      %123 = arith.cmpi ne, %121, %122 : vector<8x1xi32>
      %c0_i32_76 = arith.constant 0 : i32
      %124 = vector.broadcast %c0_i32_76 : i32 to vector<8x1xi32>
      %125 = arith.cmpi slt, %121, %124 : vector<8x1xi32>
      %c0_i32_77 = arith.constant 0 : i32
      %126 = arith.cmpi slt, %119, %c0_i32_77 : i32
      %127 = vector.broadcast %126 : i1 to vector<8x1xi1>
      %128 = vector.broadcast %127 : vector<8x1xi1> to vector<8x1xi1>
      %129 = arith.xori %125, %128 : vector<8x1xi1>
      %130 = arith.andi %129, %123 : vector<8x1xi1>
      %131 = vector.broadcast %119 : i32 to vector<8x1xi32>
      %132 = arith.addi %121, %131 : vector<8x1xi32>
      %133 = arith.select %130, %132, %121 : vector<8x1xi1>, vector<8x1xi32>
      %c0_i32_78 = arith.constant 0 : i32
      %134 = vector.broadcast %c0_i32_78 : i32 to vector<8x1xi32>
      %135 = arith.cmpi sgt, %133, %134 : vector<8x1xi32>
      %c1_i32_79 = arith.constant 1 : i32
      %136 = tpu.dynamic_rotate %116 by %c1_i32_79 dim 0 : vector<8x64xf32>, i32 -> vector<8x64xf32>
      %cst_80 = arith.constant 0.000000e+00 : f32
      %137 = vector.shape_cast %135 : vector<8x1xi1> to vector<8x1xi1>
      %138 = vector.broadcast %137 : vector<8x1xi1> to vector<8x64xi1>
      %139 = vector.broadcast %cst_80 : f32 to vector<8x64xf32>
      %140 = arith.select %138, %136, %139 : vector<8x64xi1>, vector<8x64xf32>
      %c7_i32_81 = arith.constant 7 : i32
      %141 = vector.broadcast %c7_i32_81 : i32 to vector<8x1xi32>
      %142 = arith.cmpi slt, %133, %141 : vector<8x1xi32>
      %c7_i32_82 = arith.constant 7 : i32
      %143 = tpu.dynamic_rotate %116 by %c7_i32_82 dim 0 : vector<8x64xf32>, i32 -> vector<8x64xf32>
      %cst_83 = arith.constant 0.000000e+00 : f32
      %144 = vector.shape_cast %142 : vector<8x1xi1> to vector<8x1xi1>
      %145 = vector.broadcast %144 : vector<8x1xi1> to vector<8x64xi1>
      %146 = vector.broadcast %cst_83 : f32 to vector<8x64xf32>
      %147 = arith.select %145, %143, %146 : vector<8x64xi1>, vector<8x64xf32>
      %148 = tpu.concatenate %140, %116, %147 in 1 : vector<8x64xf32>, vector<8x64xf32>, vector<8x64xf32> -> vector<8x192xf32>
      %c72 = arith.constant 72 : index
      %c0_84 = arith.constant 0 : index
      %149 = vector.load %arg12[%c72, %c0_84] : memref<80x192xf32, #tpu.memory_space<vmem>>, vector<8x192xf32>
      tpu.vector_store %arg12[%c72, %c0_84], %148 {strides = array<i32>} : memref<80x192xf32, #tpu.memory_space<vmem>>, vector<8x192xf32>,
    } else {
    }
    %cst_29 = arith.constant 0.000000e+00 : f32
    %65 = vector.broadcast %cst_29 : f32 to vector<64x128xf32>
    %c0_30 = arith.constant 0 : index
    %c0_31 = arith.constant 0 : index
    %66 = vector.load %arg12[%c0_30, %c0_31] : memref<80x192xf32, #tpu.memory_space<vmem>>, vector<64x192xf32>
    %67 = arith.truncf %66 : vector<64x192xf32> to vector<64x192xbf16>
    %c0_32 = arith.constant 0 : index
    %c0_33 = arith.constant 0 : index
    %c0_34 = arith.constant 0 : index
    %68 = vector.load %arg8[%c0_32, %c0_33, %c0_34] : memref<3x192x128xbf16, #tpu.memory_space<vmem>>, vector<1x192x128xbf16>
    %69 = vector.shape_cast %68 : vector<1x192x128xbf16> to vector<192x128xbf16>
    %cst_35 = arith.constant dense<0.000000e+00> : vector<64x128xf32>
    %70 = tpu.matmul %67, %69, %cst_35 {dimension_numbers = #tpu.dot_dimension_numbers<[1], [0], [0], [1], [0, 0, 1, 1], [], []>} : vector<64x192xbf16>, vector<192x128xbf16>, vector<64x128xf32> -> vector<64x128xf32>
    %71 = arith.addf %65, %70 : vector<64x128xf32>
    %c8_36 = arith.constant 8 : index
    %c0_37 = arith.constant 0 : index
    %72 = vector.load %arg12[%c8_36, %c0_37] : memref<80x192xf32, #tpu.memory_space<vmem>>, vector<64x192xf32>
    %73 = arith.truncf %72 : vector<64x192xf32> to vector<64x192xbf16>
    %c1 = arith.constant 1 : index
    %c0_38 = arith.constant 0 : index
    %c0_39 = arith.constant 0 : index
    %74 = vector.load %arg8[%c1, %c0_38, %c0_39] : memref<3x192x128xbf16, #tpu.memory_space<vmem>>, vector<1x192x128xbf16>
    %75 = vector.shape_cast %74 : vector<1x192x128xbf16> to vector<192x128xbf16>
    %cst_40 = arith.constant dense<0.000000e+00> : vector<64x128xf32>
    %76 = tpu.matmul %73, %75, %cst_40 {dimension_numbers = #tpu.dot_dimension_numbers<[1], [0], [0], [1], [0, 0, 1, 1], [], []>} : vector<64x192xbf16>, vector<192x128xbf16>, vector<64x128xf32> -> vector<64x128xf32>
    %77 = arith.addf %71, %76 : vector<64x128xf32>
    %c16 = arith.constant 16 : index
    %c0_41 = arith.constant 0 : index
    %78 = vector.load %arg12[%c16, %c0_41] : memref<80x192xf32, #tpu.memory_space<vmem>>, vector<64x192xf32>
    %79 = arith.truncf %78 : vector<64x192xf32> to vector<64x192xbf16>
    %c2 = arith.constant 2 : index
    %c0_42 = arith.constant 0 : index
    %c0_43 = arith.constant 0 : index
    %80 = vector.load %arg8[%c2, %c0_42, %c0_43] : memref<3x192x128xbf16, #tpu.memory_space<vmem>>, vector<1x192x128xbf16>
    %81 = vector.shape_cast %80 : vector<1x192x128xbf16> to vector<192x128xbf16>
    %cst_44 = arith.constant dense<0.000000e+00> : vector<64x128xf32>
    %82 = tpu.matmul %79, %81, %cst_44 {dimension_numbers = #tpu.dot_dimension_numbers<[1], [0], [0], [1], [0, 0, 1, 1], [], []>} : vector<64x192xbf16>, vector<192x128xbf16>, vector<64x128xf32> -> vector<64x128xf32>
    %83 = arith.addf %77, %82 : vector<64x128xf32>
    %c0_45 = arith.constant 0 : index
    %c0_46 = arith.constant 0 : index
    %c0_47 = arith.constant 0 : index
    %c0_48 = arith.constant 0 : index
    %84 = vector.load %arg2[%c0_45, %c0_46, %c0_47, %c0_48] : memref<1x8x8x128xf32, #tpu.memory_space<vmem>>, vector<1x8x8x128xf32>
    %85 = vector.shape_cast %84 : vector<1x8x8x128xf32> to vector<8x8x128xf32>
    %86 = vector.shape_cast %85 : vector<8x8x128xf32> to vector<64x128xf32>
    %c0_49 = arith.constant 0 : index
    %c0_50 = arith.constant 0 : index
    %87 = vector.load %arg9[%c0_49, %c0_50] : memref<1x128xf32, #tpu.memory_space<vmem>>, vector<1x128xf32>
    %88 = vector.broadcast %87 : vector<1x128xf32> to vector<64x128xf32>
    %89 = arith.mulf %83, %88 : vector<64x128xf32>
    %c0_51 = arith.constant 0 : index
    %c0_52 = arith.constant 0 : index
    %90 = vector.load %arg10[%c0_51, %c0_52] : memref<1x128xf32, #tpu.memory_space<vmem>>, vector<1x128xf32>
    %91 = vector.broadcast %90 : vector<1x128xf32> to vector<64x128xf32>
    %92 = arith.addf %89, %91 : vector<64x128xf32>
    %93 = arith.addf %92, %86 : vector<64x128xf32>
    %cst_53 = arith.constant 0.000000e+00 : f32
    %94 = vector.broadcast %cst_53 : f32 to vector<64x128xf32>
    %95 = arith.cmpf oge, %93, %94 : vector<64x128xf32>
    %cst_54 = arith.constant 1.000000e-01 : f32
    %96 = vector.broadcast %cst_54 : f32 to vector<64x128xf32>
    %97 = arith.mulf %96, %93 : vector<64x128xf32>
    %98 = arith.select %95, %93, %97 : vector<64x128xi1>, vector<64x128xf32>
    %99 = vector.shape_cast %98 : vector<64x128xf32> to vector<1x8x8x128xf32>
    %c0_55 = arith.constant 0 : index
    %c0_56 = arith.constant 0 : index
    %c0_57 = arith.constant 0 : index
    %c0_58 = arith.constant 0 : index
    %100 = vector.load %arg11[%c0_55, %c0_56, %c0_57, %c0_58] : memref<1x8x8x128xf32, #tpu.memory_space<vmem>>, vector<1x8x8x128xf32>
    tpu.vector_store %arg11[%c0_55, %c0_56, %c0_57, %c0_58], %99 {strides = array<i32>} : memref<1x8x8x128xf32, #tpu.memory_space<vmem>>, vector<1x8x8x128xf32>,
    return
  }
  func.func @transform_0(%arg0: i32, %arg1: i32) -> (i32, i32, i32, i32) {
    %c0_i32 = arith.constant 0 : i32
    %c0_i32_0 = arith.constant 0 : i32
    %c0_i32_1 = arith.constant 0 : i32
    return %arg0, %arg1, %c0_i32, %c0_i32_0 : i32, i32, i32, i32
  }
  func.func @transform_1(%arg0: i32, %arg1: i32) -> (i32, i32, i32, i32) {
    %c8_i32 = arith.constant 8 : i32
    %0 = arith.muli %arg1, %c8_i32 : i32
    %c1_i32 = arith.constant 1 : i32
    %1 = arith.subi %0, %c1_i32 : i32
    %c0_i32 = arith.constant 0 : i32
    %2 = arith.maxsi %1, %c0_i32 : i32
    %c0_i32_0 = arith.constant 0 : i32
    %c0_i32_1 = arith.constant 0 : i32
    %c0_i32_2 = arith.constant 0 : i32
    return %arg0, %2, %c0_i32_0, %c0_i32_1 : i32, i32, i32, i32
  }
  func.func @transform_2(%arg0: i32, %arg1: i32) -> (i32, i32, i32, i32) {
    %c8_i32 = arith.constant 8 : i32
    %0 = arith.muli %arg1, %c8_i32 : i32
    %c8_i32_0 = arith.constant 8 : i32
    %1 = arith.addi %0, %c8_i32_0 : i32
    %c7_i32 = arith.constant 7 : i32
    %2 = arith.minsi %1, %c7_i32 : i32
    %c0_i32 = arith.constant 0 : i32
    %c0_i32_1 = arith.constant 0 : i32
    %c0_i32_2 = arith.constant 0 : i32
    return %arg0, %2, %c0_i32, %c0_i32_1 : i32, i32, i32, i32
  }
  func.func @transform_3(%arg0: i32, %arg1: i32) -> (i32, i32) {
    %c0_i32 = arith.constant 0 : i32
    %c0_i32_0 = arith.constant 0 : i32
    %c0_i32_1 = arith.constant 0 : i32
    return %c0_i32, %c0_i32_0 : i32, i32
  }
  func.func @transform_4(%arg0: i32, %arg1: i32) -> (i32, i32) {
    %c0_i32 = arith.constant 0 : i32
    %c0_i32_0 = arith.constant 0 : i32
    %c0_i32_1 = arith.constant 0 : i32
    return %c0_i32, %c0_i32_0 : i32, i32
  }
  func.func @transform_5(%arg0: i32, %arg1: i32) -> (i32, i32) {
    %c0_i32 = arith.constant 0 : i32
    %c0_i32_0 = arith.constant 0 : i32
    %c0_i32_1 = arith.constant 0 : i32
    return %c0_i32, %c0_i32_0 : i32, i32
  }
  func.func @transform_6(%arg0: i32, %arg1: i32) -> (i32, i32, i32) {
    %c0_i32 = arith.constant 0 : i32
    %c0_i32_0 = arith.constant 0 : i32
    %c0_i32_1 = arith.constant 0 : i32
    %c0_i32_2 = arith.constant 0 : i32
    return %c0_i32, %c0_i32_0, %c0_i32_1 : i32, i32, i32
  }
  func.func @transform_7(%arg0: i32, %arg1: i32) -> (i32, i32) {
    %c0_i32 = arith.constant 0 : i32
    %c0_i32_0 = arith.constant 0 : i32
    %c0_i32_1 = arith.constant 0 : i32
    return %c0_i32, %c0_i32_0 : i32, i32
  }
  func.func @transform_8(%arg0: i32, %arg1: i32) -> (i32, i32) {
    %c0_i32 = arith.constant 0 : i32
    %c0_i32_0 = arith.constant 0 : i32
    %c0_i32_1 = arith.constant 0 : i32
    return %c0_i32, %c0_i32_0 : i32, i32
  }
  func.func @transform_9(%arg0: i32, %arg1: i32) -> (i32, i32, i32, i32) {
    %c0_i32 = arith.constant 0 : i32
    %c0_i32_0 = arith.constant 0 : i32
    %c0_i32_1 = arith.constant 0 : i32
    return %arg0, %arg1, %c0_i32, %c0_i32_0 : i32, i32, i32, i32
  }
}

</mosaic_0001>

<bundles_post_ra>
// kernel: tile.18
= control target key start
LH: loop header
LB: loop body
LE: loop exit
PB: predicated region body
PF: predicated region fallthrough
CT: control target
= control target key end

     0   :  { %s22_s0 = inlined_call_operand.vmem [shape: f32[8], index: 0, kind: input, shape index: {}]   ;;  %s23_s1 = inlined_call_operand.vmem [shape: f32[8,8], index: 1, kind: output, shape index: {}]  }
   0x1   :  { %v4_v0 = vld [vmem:[%s22_s0] ss:$0 sm:$0xff] }
   0x2   :  { %5 = vst [vmem:[%s23_s1] sm:$0xff] %v4_v0 }

// kernel: tile.26
= control target key start
LH: loop header
LB: loop body
LE: loop exit
PB: predicated region body
PF: predicated region fallthrough
CT: control target
= control target key end

     0   :  { %s22_s0 = inlined_call_operand.vmem [shape: f32[16], index: 0, kind: input, shape index: {}]   ;;  %s23_s1 = inlined_call_operand.vmem [shape: f32[8,16], index: 1, kind: output, shape index: {}]  }
   0x1   :  { %v4_v0 = vld [vmem:[%s22_s0] ss:$0 sm:$0xff] }
   0x2   :  { %5 = vst [vmem:[%s23_s1] sm:$0xff] %v4_v0 }

// kernel: tile.19
= control target key start
LH: loop header
LB: loop body
LE: loop exit
PB: predicated region body
PF: predicated region fallthrough
CT: control target
= control target key end

     0   :  { %s69_s10 = smov 56   ;;  %s70_s11 = smov 40   ;;  %vm3_vm0 = vcmask 64512   ;;  %vm9_vm1 = vcmask 523712   ;;  %vm15_vm2 = vcmask 458112   ;;  %vm21_vm3 = vcmask 392512   ;;  %s113_s0 = inlined_call_operand.vmem [shape: f32[8,8], index: 0, kind: input, shape index: {}]   ;;  %s114_s1 = inlined_call_operand.vmem [shape: f32[1,64], index: 1, kind: output, shape index: {}]  }
   0x1   :  { %v55_v0 = vld [vmem:[%s113_s0 + $0x7] sm:$0x1]   ;;  %v57_v1 = vld [vmem:[%s113_s0 + $0x5] sm:$0x1]   ;;  %v56_v2 = vld [vmem:[%s113_s0 + $0x6] sm:$0x1]  }
   0x2   :  { %7 = vrot.lane.b32.xlu0 %v55_v0, %s69_s10  ;;  %19 = vrot.lane.b32.xlu1 %v57_v1, %s70_s11  ;;  %v58_v3 = vld [vmem:[%s113_s0 + $0x4] sm:$0x1]   ;;  %v2_v4 = vld [vmem:[%s113_s0] sm:$0x1]   ;;  %s71_s18 = smov 48   ;;  %s72_s19 = smov 32  }
   0x3   :  { %4 = vst.msk [vmem:[#allocation0] sm:$0x1] %vm3_vm0, %v2_v4   ;;  %v59_v5 = vld [vmem:[%s113_s0 + $0x3] sm:$0x1]   ;;  %v60_v6 = vld [vmem:[%s113_s0 + $0x2] sm:$0x1]  }
   0x4   :  { %s73_s24 = smov 24   ;;  %s74_s25 = smov 16   ;;  %v61_v7 = vld [vmem:[%s113_s0 + $0x1] sm:$0x1]   ;;  %vm27_vm4 = vcmask 326912   ;;  %vm33_vm5 = vcmask 261312  }
   0x5   :  { %s75_s0 = smov 8   ;;  %vm39_vm6 = vcmask 195712   ;;  %vm45_vm7 = vcmask 130112  }
   0x6   :  { %13 = vrot.lane.b32.xlu0 %v56_v2, %s71_s18  ;;  %25 = vrot.lane.b32.xlu1 %v58_v3, %s72_s19 }
   0xa   :  { %31 = vrot.lane.b32.xlu0 %v59_v5, %s73_s24  ;;  %37 = vrot.lane.b32.xlu1 %v60_v6, %s74_s25 }
   0xe   :  { %43 = vrot.lane.b32.xlu0 %v61_v7, %s75_s0 }
  0x74   :  { %v8_v8 = vpop.permute.xlu0 %7   ;;  %v20_v9 = vpop.permute.xlu1 %19  }
  0x75   :  { %10 = vst.msk [vmem:[#allocation0] sm:$0x1] %vm9_vm1, %v8_v8  }
  0x78   :  { %v14_v10 = vpop.permute.xlu0 %13   ;;  %v26_v11 = vpop.permute.xlu1 %25  }
  0x79   :  { %16 = vst.msk [vmem:[#allocation0] sm:$0x1] %vm15_vm2, %v14_v10  }
  0x7a   :  { %22 = vst.msk [vmem:[#allocation0] sm:$0x1] %vm21_vm3, %v20_v9  }
  0x7b   :  { %28 = vst.msk [vmem:[#allocation0] sm:$0x1] %vm27_vm4, %v26_v11  }
  0x7c   :  { %v32_v12 = vpop.permute.xlu0 %31   ;;  %v38_v13 = vpop.permute.xlu1 %37  }
  0x7d   :  { %34 = vst.msk [vmem:[#allocation0] sm:$0x1] %vm33_vm5, %v32_v12  }
  0x7e   :  { %40 = vst.msk [vmem:[#allocation0] sm:$0x1] %vm39_vm6, %v38_v13  }
  0x80   :  { %v44_v14 = vpop.permute.xlu0 %43  }
  0x81   :  { %46 = vst.msk [vmem:[#allocation0] sm:$0x1] %vm45_vm7, %v44_v14  }
  0x88   :  { %v51_v15 = vld [vmem:[#allocation0] sm:$0x1] }
  0x89   :  { %54 = vst [vmem:[%s114_s1] sm:$0x1] %v51_v15 }

// kernel: tile.27
= control target key start
LH: loop header
LB: loop body
LE: loop exit
PB: predicated region body
PF: predicated region fallthrough
CT: control target
= control target key end

     0   :  { %s69_s10 = smov 112   ;;  %s70_s11 = smov 80   ;;  %vm3_vm0 = vcmask 130048   ;;  %vm9_vm1 = vcmask 1048448   ;;  %vm15_vm2 = vcmask 917248   ;;  %vm21_vm3 = vcmask 786048   ;;  %s113_s0 = inlined_call_operand.vmem [shape: f32[8,16], index: 0, kind: input, shape index: {}]   ;;  %s114_s1 = inlined_call_operand.vmem [shape: f32[1,128], index: 1, kind: output, shape index: {}]  }
   0x1   :  { %v55_v0 = vld [vmem:[%s113_s0 + $0x7] sm:$0x1]   ;;  %v57_v1 = vld [vmem:[%s113_s0 + $0x5] sm:$0x1]   ;;  %v56_v2 = vld [vmem:[%s113_s0 + $0x6] sm:$0x1]  }
   0x2   :  { %7 = vrot.lane.b32.xlu0 %v55_v0, %s69_s10  ;;  %19 = vrot.lane.b32.xlu1 %v57_v1, %s70_s11  ;;  %v58_v3 = vld [vmem:[%s113_s0 + $0x4] sm:$0x1]   ;;  %v2_v4 = vld [vmem:[%s113_s0] sm:$0x1]   ;;  %s71_s18 = smov 96   ;;  %s72_s19 = smov 64  }
   0x3   :  { %4 = vst.msk [vmem:[#allocation0] sm:$0x1] %vm3_vm0, %v2_v4   ;;  %v59_v5 = vld [vmem:[%s113_s0 + $0x3] sm:$0x1]   ;;  %v60_v6 = vld [vmem:[%s113_s0 + $0x2] sm:$0x1]  }
   0x4   :  { %s73_s24 = smov 48   ;;  %s74_s25 = smov 32   ;;  %v61_v7 = vld [vmem:[%s113_s0 + $0x1] sm:$0x1]   ;;  %vm27_vm4 = vcmask 654848   ;;  %vm33_vm5 = vcmask 523648  }
   0x5   :  { %s75_s0 = smov 16   ;;  %vm39_vm6 = vcmask 392448   ;;  %vm45_vm7 = vcmask 261248  }
   0x6   :  { %13 = vrot.lane.b32.xlu0 %v56_v2, %s71_s18  ;;  %25 = vrot.lane.b32.xlu1 %v58_v3, %s72_s19 }
   0xa   :  { %31 = vrot.lane.b32.xlu0 %v59_v5, %s73_s24  ;;  %37 = vrot.lane.b32.xlu1 %v60_v6, %s74_s25 }
   0xe   :  { %43 = vrot.lane.b32.xlu0 %v61_v7, %s75_s0 }
  0x74   :  { %v8_v8 = vpop.permute.xlu0 %7   ;;  %v20_v9 = vpop.permute.xlu1 %19  }
  0x75   :  { %10 = vst.msk [vmem:[#allocation0] sm:$0x1] %vm9_vm1, %v8_v8  }
  0x78   :  { %v14_v10 = vpop.permute.xlu0 %13   ;;  %v26_v11 = vpop.permute.xlu1 %25  }
  0x79   :  { %16 = vst.msk [vmem:[#allocation0] sm:$0x1] %vm15_vm2, %v14_v10  }
  0x7a   :  { %22 = vst.msk [vmem:[#allocation0] sm:$0x1] %vm21_vm3, %v20_v9  }
  0x7b   :  { %28 = vst.msk [vmem:[#allocation0] sm:$0x1] %vm27_vm4, %v26_v11  }
  0x7c   :  { %v32_v12 = vpop.permute.xlu0 %31   ;;  %v38_v13 = vpop.permute.xlu1 %37  }
  0x7d   :  { %34 = vst.msk [vmem:[#allocation0] sm:$0x1] %vm33_vm5, %v32_v12  }
  0x7e   :  { %40 = vst.msk [vmem:[#allocation0] sm:$0x1] %vm39_vm6, %v38_v13  }
  0x80   :  { %v44_v14 = vpop.permute.xlu0 %43  }
  0x81   :  { %46 = vst.msk [vmem:[#allocation0] sm:$0x1] %vm45_vm7, %v44_v14  }
  0x88   :  { %v51_v15 = vld [vmem:[#allocation0] sm:$0x1] }
  0x89   :  { %54 = vst [vmem:[%s114_s1] sm:$0x1] %v51_v15 }

// kernel: _lambda_.1
= control target key start
LH: loop header
LB: loop body
LE: loop exit
PB: predicated region body
PF: predicated region fallthrough
CT: control target
= control target key end

     0   :  { %s2360_s28 = smov 0   ;;  %s2362_s29 = smov 0   ;;  %s2909_s0 = inlined_call_operand.vmem [shape: f32[2,8,8,128], index: 0, kind: input, shape index: {}, may-alias: {0,1,2}]   ;;  %s2910_s1 = inlined_call_operand.vmem [shape: f32[2,8,8,128], index: 1, kind: input, shape index: {}, may-alias: {0,1,2}]   ;;  %s2911_s2 = inlined_call_operand.vmem [shape: f32[2,8,8,128], index: 2, kind: input, shape index: {}, may-alias: {0,1,2}]   ;;  %s2912_s3 = inlined_call_operand.vmem [shape: bf16[128,64], index: 3, kind: input, shape index: {}]   ;;  %s2913_s4 = inlined_call_operand.vmem [shape: f32[1,64], index: 4, kind: input, shape index: {}]   ;;  %s2914_s5 = inlined_call_operand.vmem [shape: f32[1,64], index: 5, kind: input, shape index: {}]   ;;  %s2915_s6 = inlined_call_operand.vmem [shape: bf16[3,192,128], index: 6, kind: input, shape index: {}]   ;;  %s2916_s7 = inlined_call_operand.vmem [shape: f32[1,128], index: 7, kind: input, shape index: {}]   ;;  %s2917_s8 = inlined_call_operand.vmem [shape: f32[1,128], index: 8, kind: input, shape index: {}]   ;;  %s2918_s9 = inlined_call_operand.vmem [shape: f32[2,8,8,128], index: 9, kind: output, shape index: {}]  }
   0x1   :  { %s2364_s30 = smov 0  }
   0x2 LB: > { %s31_s10 = sadd.s32 1, %s2301_s29  ;;  %p2032_p0 = scmp.ge.s32.totalorder %s2305_s30, 1  ;;  %s2305_s30 = sphi %s2364_s30, %s19_s30   ;;  %s2301_s29 = sphi %s2362_s29, %s2998_s29   ;;  %s2297_s28 = sphi %s2360_s28, %s2997_s28  }
   0x3   : > { %p33_p1 = scmp.ge.s32.totalorder %s31_s10, 2  ;;  %p370_p2 = scmp.lt.s32.totalorder %s2305_s30, 3 }
   0x5   : > { %s3000_s10 = smov (%p33_p1, %s31_s10), 0  ;;  %p371_p3 = pnand %p2032_p0, %p370_p2 }
   0x6   : > { %p439_p4 = scmp.lt.s32.totalorder (!%p371_p3), %s2297_s28, 1  ;;  %s2309_s13 = smov (!%p371_p3), 64  }
   0x7   : > { %374 = sbr.rel (%p371_p3) target bundleno = 651 (0x28b), region = 56 }
   0xc   : > { %v2239_v0 = vld [vmem:[%s2912_s3 + $0x38] sm:$0xff]   ;;  %v2240_v1 = vld [vmem:[%s2912_s3 + $0x30] sm:$0xff]   ;;  %s3002_s28 = smov (!%p439_p4, %s2297_s28), 1  ;;  %v2241_v2 = vld [vmem:[%s2912_s3 + $0x28] sm:$0xff]   ;;  %vm2919_vm0 = vcmask 523264   ;;  %v2307_v20 = vmov 0.0   ;;  %v686_v40 = vlaneseq }
   0xd   : > { %2188 = vmatprep.subr.bf16.mxu0 %v2239_v0  ;;  %s2171_s17 = sshll.u32 %s3002_s28, 6  ;;  %v2242_v3 = vld [vmem:[%s2912_s3 + $0x20] sm:$0xff]   ;;  %v2243_v7 = vld [vmem:[%s2912_s3 + $0x18] sm:$0xff]   ;;  %v2244_v8 = vld [vmem:[%s2912_s3 + $0x10] sm:$0xff]   ;;  %951 = vst.msk [vmem:[#allocation2 + $0x8] sm:$0xff] %vm2919_vm0, %v2307_v20  ;;  %v2308_v23 = vmov 0  }
   0xe   : > { %2189 = vmatpush3.bf16.msra.mxu0 %v2239_v0  ;;  %s2395_s20 = scalar_lea.vmem %s2909_s0, %s2171_s17  ;;  %v2245_v9 = vld [vmem:[%s2912_s3 + $0x8] sm:$0xff]   ;;  %v2246_v10 = vld [vmem:[%s2912_s3] sm:$0xff]   ;;  %1100 = vst.msk [vmem:[#allocation2 + $0x98] sm:$0xff] %vm2919_vm0, %v2307_v20  ;;  %v2247_v21 = vld [vmem:[%s2915_s6 + $0x38] sm:$0xff]   ;;  %1407 = vmatprep.subr.bf16.mxu1 %v2308_v23  ;;  %v2505_v42 = vshrl.u32 %v686_v40, 7  ;;  %s2867_s2 = scalar_lea.vmem %s2918_s9, %s2171_s17 }
   0xf   : > { %2190 = vmatprep.subr.bf16.mxu0 %v2240_v1  ;;  %v2401_v4 = vld [vmem:[%s2395_s20] sm:$0xff]  ;;  %v492_v5 = vld [vmem:[%s2395_s20 + $0x8] sm:$0xff]  ;;  %v493_v11 = vld [vmem:[%s2395_s20 + $0x10] sm:$0xff] }
  0x10   : > { %v499_v6 = vpack.c.bf16 %v492_v5, %v2401_v4  ;;  %v494_v12 = vld [vmem:[%s2395_s20 + $0x18] sm:$0xff]  ;;  %v495_v13 = vld [vmem:[%s2395_s20 + $0x20] sm:$0xff]  ;;  %v496_v14 = vld [vmem:[%s2395_s20 + $0x28] sm:$0xff]  ;;  %v2524_v48 = vadd.s32 8, %v2505_v42  ;;  %v689_v49 = vadd.s32 16, %v2505_v42  ;;  %v690_v52 = vadd.s32 24, %v2505_v42 }
  0x11   : > { %v500_v15 = vpack.c.bf16 %v494_v12, %v493_v11  ;;  %v501_v16 = vpack.c.bf16 %v496_v14, %v495_v13  ;;  %v497_v17 = vld [vmem:[%s2395_s20 + $0x30] sm:$0xff]  ;;  %v498_v18 = vld [vmem:[%s2395_s20 + $0x38] sm:$0xff]  ;;  %v2251_v26 = vld [vmem:[%s2915_s6 + $0x28] sm:$0xff]   ;;  %vm2920_vm1 = vcmp.lt.s32.totalorder %v2505_v42, 7  ;;  %v699_v58 = vand.u32 7, %v2505_v42 }
  0x12   : > { %2191 = vmatpush3.bf16.msra.mxu0 %v2240_v1  ;;  %2204 = vmatprep.mubr.bf16.mxu0 %v499_v6  ;;  %v502_v19 = vpack.c.bf16 %v498_v18, %v497_v17  ;;  %v2248_v22 = vld [vmem:[%s2915_s6 + $0x98] sm:$0xff]   ;;  %v2249_v24 = vld [vmem:[%s2915_s6 + $0x30] sm:$0xff]   ;;  %v2252_v27 = vld [vmem:[%s2915_s6 + $0x88] sm:$0xff]   ;;  %v706_v59 = vand.u32 7, %v2524_v48  ;;  %v713_v60 = vand.u32 7, %v689_v49  ;;  %v2543_v61 = vadd.s32 32, %v2505_v42 }
  0x13   : > { %2192 = vmatprep.subr.bf16.mxu0 %v2241_v2  ;;  %1408 = vmatpush1.bf16.msra.mxu1 %v2248_v22  ;;  %v2250_v25 = vld [vmem:[%s2915_s6 + $0x90] sm:$0xff]   ;;  %v2253_v28 = vld [vmem:[%s2915_s6 + $0x20] sm:$0xff]   ;;  %v2255_v30 = vld [vmem:[%s2915_s6 + $0x18] sm:$0xff]   ;;  %v2552_v5 = vadd.s32 48, %v2505_v42  ;;  %v2555_v6 = vadd.s32 40, %v2505_v42  ;;  %vm2568_vm4 = vcmp.lt.s32.totalorder %v699_v58, 7 }
  0x14   : > { %1409 = vmatprep.subr.bf16.mxu1 %v2308_v23  ;;  %v2254_v29 = vld [vmem:[%s2915_s6 + $0x80] sm:$0xff]   ;;  %v2256_v31 = vld [vmem:[%s2915_s6 + $0x78] sm:$0xff]   ;;  %v2257_v32 = vld [vmem:[%s2915_s6 + $0x10] sm:$0xff]   ;;  %vm2572_vm5 = vcmp.lt.s32.totalorder %v706_v59, 7  ;;  %vm2579_vm7 = vcmp.lt.s32.totalorder %v713_v60, 7  ;;  %vm2586_vm8 = vcmp.gt.s32.totalorder %v713_v60, 0 }
  0x15   : > { %v2258_v33 = vld [vmem:[%s2915_s6 + $0x70] sm:$0xff]   ;;  %v2259_v34 = vld [vmem:[%s2915_s6 + $0x8] sm:$0xff]   ;;  %v2261_v36 = vld [vmem:[%s2915_s6] sm:$0xff]   ;;  %vm2618_vm13 = vcmp.gt.s32.totalorder %v706_v59, 0  ;;  %vm2625_vm15 = vcmp.gt.s32.totalorder %v699_v58, 0 }
  0x16   : > { %2193 = vmatpush3.bf16.msra.mxu0 %v2241_v2  ;;  %v2260_v35 = vld [vmem:[%s2915_s6 + $0x68] sm:$0xff]   ;;  %v2262_v37 = vld [vmem:[%s2915_s6 + $0x60] sm:$0xff]   ;;  %v2263_v38 = vld [vmem:[%s2915_s6 + $0x58] sm:$0xff]   ;;  %v720_v2 = vand.u32 7, %v690_v52 }
  0x17   : > { %2194 = vmatprep.subr.bf16.mxu0 %v2242_v3  ;;  %1410 = vmatpush1.bf16.msra.mxu1 %v2250_v25  ;;  %v2264_v39 = vld [vmem:[%s2915_s6 + $0xb8] sm:$0xff]   ;;  %v2265_v41 = vld [vmem:[%s2915_s6 + $0x50] sm:$0xff]   ;;  %v2510_v43 = vld [vmem:[%s2913_s4] ss:$0 sm:$0xff]  ;;  %v741_v25 = vand.u32 7, %v2552_v5 }
  0x18   : > { %1411 = vmatprep.subr.bf16.mxu1 %v2308_v23  ;;  %v2266_v44 = vld [vmem:[%s2915_s6 + $0xb0] sm:$0xff]   ;;  %v2267_v45 = vld [vmem:[%s2915_s6 + $0x48] sm:$0xff]   ;;  %v2521_v47 = vld [vmem:[%s2914_s5] ss:$0 sm:$0xff]  ;;  %vm2600_vm10 = vcmp.lt.s32.totalorder %v720_v2, 7  ;;  %vm2608_vm12 = vcmp.gt.s32.totalorder %v720_v2, 0 }
  0x19   : > { %v2268_v53 = vld [vmem:[%s2915_s6 + $0xa8] sm:$0xff]   ;;  %v2269_v56 = vld [vmem:[%s2915_s6 + $0x40] sm:$0xff]   ;;  %vm2648_vm9 = vcmp.gt.s32.totalorder %v741_v25, 0  ;;  %v2947_v2 = vmov 0 }
  0x1a   : > { %2195 = vmatpush3.bf16.msra.mxu0 %v2242_v3  ;;  %v2270_v3 = vld [vmem:[%s2915_s6 + $0xa0] sm:$0xff]  }
  0x1b   : > { %2196 = vmatprep.subr.bf16.mxu0 %v2243_v7  ;;  %1412 = vmatpush1.bf16.msra.mxu1 %v2252_v27 }
  0x1c   : > { %1413 = vmatprep.subr.bf16.mxu1 %v2308_v23 }
  0x1e   : > { %2197 = vmatpush3.bf16.msra.mxu0 %v2243_v7  ;;  %v2558_v7 = vadd.s32 56, %v2505_v42 }
  0x1f   : > { %2198 = vmatprep.subr.bf16.mxu0 %v2244_v8  ;;  %1414 = vmatpush1.bf16.msra.mxu1 %v2254_v29 }
  0x20   : > { %1415 = vmatprep.subr.bf16.mxu1 %v2308_v23  ;;  %v748_v27 = vand.u32 7, %v2558_v7 }
  0x22   : > { %2199 = vmatpush3.bf16.msra.mxu0 %v2244_v8 }
  0x23   : > { %2200 = vmatprep.subr.bf16.mxu0 %v2245_v9  ;;  %1416 = vmatpush1.bf16.msra.mxu1 %v2256_v31 }
  0x24   : > { %1417 = vmatprep.subr.bf16.mxu1 %v2308_v23 }
  0x26   : > { %2201 = vmatpush3.bf16.msra.mxu0 %v2245_v9 }
  0x27   : > { %2202 = vmatprep.subr.bf16.mxu0 %v2246_v10  ;;  %1418 = vmatpush1.bf16.msra.mxu1 %v2258_v33 }
  0x28   : > { %1419 = vmatprep.subr.bf16.mxu1 %v2308_v23 }
  0x2a   : > { %2203 = vmatpush3.bf16.msra.mxu0 %v2246_v10 }
  0x2b   : > { %1556 = vmatprep.subr.bf16.mxu0 %v2308_v23  ;;  %1420 = vmatpush1.bf16.msra.mxu1 %v2260_v35 }
  0x2c   : > { %1421 = vmatprep.subr.bf16.mxu1 %v2308_v23 }
  0x2d   : > { %2205 = vmatmul.mubr.bf16.vlgmr.msra.gmra.mxu0 %v500_v15  ;;  %v727_v15 = vand.u32 7, %v2543_v61  ;;  %v2943_v61 = vmov 0 }
  0x2e   : > { %2208 = vmatprep.mubr.bf16.mxu0 %v501_v16  ;;  %1557 = vmatpush1.bf16.msra.mxu0 %v2247_v21  ;;  %v2944_v61 = vsel %vm2648_vm9, 4294967295, %v2943_v61  ;;  %vm2668_vm9 = vcmp.lt.s32.totalorder %v748_v27, 7 }
  0x2f   : > { %1558 = vmatprep.subr.bf16.mxu0 %v2308_v23  ;;  %1422 = vmatpush1.bf16.msra.mxu1 %v2262_v37 }
  0x30   : > { %1431 = vmatprep.subr.bf16.mxu1 %v2308_v23 }
  0x32   : > { %1559 = vmatpush1.bf16.msra.mxu0 %v2249_v24 }
  0x33   : > { %1560 = vmatprep.subr.bf16.mxu0 %v2308_v23  ;;  %1432 = vmatpush2.bf16.msra.mxu1 %v2264_v39 }
  0x34   : > { %1433 = vmatprep.subr.bf16.mxu1 %v2308_v23 }
  0x35   : > { %2209 = vmatmul.mubr.bf16.gmra.mxu0 %v502_v19 }
  0x36   : > { %1561 = vmatpush1.bf16.msra.mxu0 %v2251_v26  ;;  %v734_v26 = vand.u32 7, %v2555_v6 }
  0x37   : > { %1562 = vmatprep.subr.bf16.mxu0 %v2308_v23  ;;  %1434 = vmatpush2.bf16.msra.mxu1 %v2266_v44 }
  0x38   : > { %1435 = vmatprep.subr.bf16.mxu1 %v2308_v23  ;;  %vm2660_vm0 = vcmp.gt.s32.totalorder %v734_v26, 0 }
  0x3a   : > { %1563 = vmatpush1.bf16.msra.mxu0 %v2253_v28 }
  0x3b   : > { %1564 = vmatprep.subr.bf16.mxu0 %v2308_v23  ;;  %1436 = vmatpush2.bf16.msra.mxu1 %v2268_v53 }
  0x3c   : > { %1437 = vmatprep.subr.bf16.mxu1 %v2308_v23 }
  0x3e   : > { %1565 = vmatpush1.bf16.msra.mxu0 %v2255_v30 }
  0x3f   : > { %1566 = vmatprep.subr.bf16.mxu0 %v2308_v23  ;;  %1438 = vmatpush2.bf16.msra.mxu1 %v2270_v3  ;;  %v2949_v3 = vmov 0 }
  0x40   : > { %1754 = vmatprep.subr.bf16.mxu1 %v2308_v23  ;;  %v2950_v3 = vsel %vm2668_vm9, 4294967295, %v2949_v3 }
  0x42   : > { %1567 = vmatpush1.bf16.msra.mxu0 %v2257_v32  ;;  %v1241_v32 = vld [vmem:[#allocation2 + $0x8] sm:$0xff] }
  0x43   : > { %1568 = vmatprep.subr.bf16.mxu0 %v2308_v23 }
  0x46   : > { %1569 = vmatpush1.bf16.msra.mxu0 %v2259_v34 }
  0x47   : > { %1570 = vmatprep.subr.bf16.mxu0 %v2308_v23 }
  0x4a   : > { %1571 = vmatpush1.bf16.msra.mxu0 %v2261_v36 }
  0x4b   : > { %1580 = vmatprep.subr.bf16.mxu0 %v2308_v23 }
  0x4e   : > { %1581 = vmatpush2.bf16.msra.mxu0 %v2263_v38 }
  0x4f   : > { %1582 = vmatprep.subr.bf16.mxu0 %v2308_v23 }
  0x52   : > { %1583 = vmatpush2.bf16.msra.mxu0 %v2265_v41 }
  0x53   : > { %1584 = vmatprep.subr.bf16.mxu0 %v2308_v23 }
  0x56   : > { %1585 = vmatpush2.bf16.msra.mxu0 %v2267_v45 }
  0x57   : > { %1586 = vmatprep.subr.bf16.mxu0 %v2308_v23 }
  0x5a   : > { %1587 = vmatpush2.bf16.msra.mxu0 %v2269_v56 }
  0xed   : > { %v2206_v46 = vpop.f32.mrf.mxu0 }
  0xee   : > { %v641_v50 = vmul.f32 %v2206_v46, %v2510_v43 }
  0xef   : > { %v601_v51 = vpop.f32.mrf.mxu0 }
  0xf0   : > { %v656_v54 = vadd.f32 %v2521_v47, %v641_v50  ;;  %v639_v55 = vmul.f32 %v2510_v43, %v601_v51 }
  0xf1   : > { %v2207_v57 = vpop.f32.mrf.mxu0 }
  0xf2   : > { %v654_v62 = vadd.f32 %v2521_v47, %v639_v55  ;;  %v642_v63 = vmul.f32 %v2207_v57, %v2510_v43  ;;  %vm664_vm2 = vcmp.ge.f32.partialorder %v656_v54, 0.0  ;;  %v672_v0 = vmul.f32 0.1, %v656_v54 }
  0xf3   : > { %v604_v1 = vpop.f32.mrf.mxu0 }
  0xf4   : > { %v657_v8 = vadd.f32 %v2521_v47, %v642_v63  ;;  %v640_v9 = vmul.f32 %v2510_v43, %v604_v1  ;;  %v2562_v10 = vsel %vm664_vm2, %v656_v54, %v672_v0  ;;  %vm662_vm3 = vcmp.ge.f32.partialorder %v654_v62, 0.0 }
  0xf5   : > { %901 = vrot.lane.b32.xlu1 %v2562_v10, %s2309_s13  ;;  %v2210_v11 = vpop.f32.mrf.mxu0  ;;  %v670_v12 = vmul.f32 0.1, %v654_v62  ;;  %v801_v28 = vrot.slane %v2562_v10, 7  ;;  %v850_v29 = vrot.slane %v2562_v10, 1  ;;  %vm2633_vm2 = vcmp.gt.s32.totalorder %v727_v15, 0 }
  0xf6   : > { %v655_v16 = vadd.f32 %v2521_v47, %v640_v9  ;;  %v645_v17 = vmul.f32 %v2210_v11, %v2510_v43  ;;  %vm665_vm6 = vcmp.ge.f32.partialorder %v657_v8, 0.0  ;;  %v673_v18 = vmul.f32 0.1, %v657_v8 }
  0xf7   : > { %v2584_v21 = vsel %vm662_vm3, %v654_v62, %v670_v12  ;;  %v617_v22 = vpop.f32.mrf.mxu0  ;;  %vm2637_vm3 = vcmp.lt.s32.totalorder %v727_v15, 7  ;;  %v2945_v1 = vmov 0 }
  0xf8   : > { %v660_v30 = vadd.f32 %v2521_v47, %v645_v17  ;;  %897 = vrot.lane.b32.xlu0 %v2584_v21, %s2309_s13  ;;  %v643_v31 = vmul.f32 %v2510_v43, %v617_v22  ;;  %v799_v33 = vrot.slane %v2584_v21, 7  ;;  %v2606_v34 = vsel %vm665_vm6, %v657_v8, %v673_v18 }
  0xf9   : > { %v2211_v35 = vpop.f32.mrf.mxu0  ;;  %vm663_vm11 = vcmp.ge.f32.partialorder %v655_v16, 0.0  ;;  %v671_v36 = vmul.f32 0.1, %v655_v16  ;;  %v848_v38 = vrot.slane %v2584_v21, 1  ;;  %903 = vrot.lane.b32.xlu1 %v2606_v34, %s2309_s13  ;;  %v851_v40 = vrot.slane %v2606_v34, 1 }
  0xfa   : > { %v658_v39 = vadd.f32 %v2521_v47, %v643_v31  ;;  %v646_v41 = vmul.f32 %v2211_v35, %v2510_v43  ;;  %v802_v45 = vrot.slane %v2606_v34, 7  ;;  %vm668_vm14 = vcmp.ge.f32.partialorder %v660_v30, 0.0 }
  0xfb   : > { %v679_v46 = vsel %vm663_vm11, %v655_v16, %v671_v36  ;;  %v620_v48 = vpop.f32.mrf.mxu0  ;;  %v676_v49 = vmul.f32 0.1, %v660_v30  ;;  %v861_v51 = vsel %vm2920_vm1, %v850_v29, %v851_v40  ;;  %vm2641_vm6 = vcmp.lt.s32.totalorder %v741_v25, 7 }
  0xfc   : > { %v661_v52 = vadd.f32 %v2521_v47, %v646_v41  ;;  %899 = vrot.lane.b32.xlu0 %v679_v46, %s2309_s13  ;;  %v800_v53 = vrot.slane %v679_v46, 7  ;;  %v849_v54 = vrot.slane %v679_v46, 1  ;;  %v644_v58 = vmul.f32 %v2510_v43, %v620_v48 }
  0xfd   : > { %vm666_vm11 = vcmp.ge.f32.partialorder %v658_v39, 0.0  ;;  %v674_v59 = vmul.f32 0.1, %v658_v39  ;;  %v2646_v60 = vsel %vm668_vm14, %v660_v30, %v676_v49  ;;  %v2946_v1 = vsel %vm2660_vm0, 4294967295, %v2945_v1 }
  0xfe   : > { %v862_v62 = vsel %vm2920_vm1, %v849_v54, %v850_v29  ;;  %v863_v63 = vsel %vm2920_vm1, %v848_v38, %v849_v54  ;;  %v805_v0 = vrot.slane %v2646_v60, 7  ;;  %v854_v43 = vrot.slane %v2646_v60, 1 }
  0xff   : > { %vm2664_vm14 = vcmp.lt.s32.totalorder %v734_v26, 7  ;;  %v881_v5 = vsel %vm2568_vm4, %v863_v63, 0.0  ;;  %v882_v6 = vsel %vm2572_vm5, %v862_v62, 0.0  ;;  %v659_v7 = vadd.f32 %v2521_v47, %v644_v58 }
 0x100   : > { %v2948_v2 = vsel %vm2664_vm14, 4294967295, %v2947_v2  ;;  %v682_v8 = vsel %vm666_vm11, %v658_v39, %v674_v59  ;;  %vm2677_vm1 = vcmp.gt.s32.totalorder %v748_v27, 0  ;;  %vm2953_vm0 = vcmask 523264  }
 0x101   : > { %931 = vst.msk [vmem:[#allocation2 + $0x18] sm:$0xff] %vm2953_vm0, %v881_v5  ;;  %vm2954_vm14 = vmmov %vm2953_vm0  ;;  %905 = vrot.lane.b32.xlu0 %v682_v8, %s2309_s13  ;;  %v803_v11 = vrot.slane %v682_v8, 7  ;;  %v852_v12 = vrot.slane %v682_v8, 1  ;;  %vm669_vm9 = vcmp.ge.f32.partialorder %v661_v52, 0.0  ;;  %v677_v13 = vmul.f32 0.1, %v661_v52 }
 0x102   : > { %933 = vst.msk [vmem:[#allocation2 + $0x28] sm:$0xff] %vm2954_vm14, %v882_v6  ;;  %vm667_vm4 = vcmp.ge.f32.partialorder %v659_v7, 0.0  ;;  %v675_v14 = vmul.f32 0.1, %v659_v7  ;;  %v883_v47 = vsel %vm2579_vm7, %v861_v51, 0.0  ;;  %vm2955_vm5 = vcmp.lt.s32.totalorder %v2505_v42, 1  ;;  %vm2957_vm11 = vmmov %vm2954_vm14 }
 0x103   : > { %v813_v15 = vsel %vm2955_vm5, %v800_v53, %v801_v28  ;;  %vm2956_vm0 = vcmp.lt.s32.totalorder %v2505_v42, 7  ;;  %v685_v17 = vsel %vm669_vm9, %v661_v52, %v677_v13  ;;  %935 = vst.msk [vmem:[#allocation2 + $0x38] sm:$0xff] %vm2957_vm11, %v883_v47  ;;  %vm2958_vm7 = vmmov %vm2955_vm5 }
 0x104   : > { %v860_v16 = vsel %vm2956_vm0, %v851_v40, %v852_v12  ;;  %v834_v18 = vsel %vm2586_vm8, %v813_v15, 0.0  ;;  %v812_v19 = vsel %vm2958_vm7, %v801_v28, %v802_v45  ;;  %v683_v22 = vsel %vm667_vm4, %v659_v7, %v675_v14  ;;  %vm2959_vm8 = vmmov %vm2957_vm11 }
 0x105   : > { %v806_v25 = vrot.slane %v685_v17, 7  ;;  %v855_v26 = vrot.slane %v685_v17, 1  ;;  %v884_v27 = vsel %vm2600_vm10, %v860_v16, 0.0  ;;  %909 = vrot.lane.b32.xlu0 %v2646_v60, %s2309_s13  ;;  %907 = vrot.lane.b32.xlu1 %v683_v22, %s2309_s13  ;;  %v804_v24 = vrot.slane %v683_v22, 7  ;;  %vm2960_vm9 = vmmov %vm2955_vm5 }
 0x106   : > { %v853_v29 = vrot.slane %v683_v22, 1  ;;  %937 = vst.msk [vmem:[#allocation2 + $0x48] sm:$0xff] %vm2959_vm8, %v884_v27  ;;  %v835_v10 = vsel %vm2608_vm12, %v812_v19, 0.0  ;;  %v814_v28 = vsel %vm2960_vm9, %v799_v33, %v800_v53  ;;  %vm2961_vm14 = vmmov %vm2956_vm0  ;;  %vm2969_vm11 = vnez %v2944_v61  ;;  %v2273_v19 = vld [vmem:[%s2915_s6 + $0xe8] sm:$0xff]  }
 0x107   : > { %v857_v30 = vsel %vm2961_vm14, %v854_v43, %v855_v26  ;;  %vm2962_vm10 = vmmov %vm2956_vm0  ;;  %v833_v36 = vsel %vm2618_vm13, %v814_v28, 0.0  ;;  %vm2975_vm9 = vnez %v2950_v3  ;;  %v2271_v3 = vld [vmem:[%s2915_s6 + $0xf8] sm:$0xff]  }
 0x108   : > { %v864_v31 = vsel %vm2962_vm10, %v855_v26, %v848_v38  ;;  %vm2963_vm4 = vmmov %vm2955_vm5  ;;  %v1243_v38 = vld [vmem:[#allocation2 + $0x18] sm:$0xff]  ;;  %v887_v48 = vsel %vm2641_vm6, %v857_v30, 0.0 }
 0x109   : > { %v815_v35 = vsel %vm2963_vm4, %v806_v25, %v799_v33  ;;  %vm2964_vm12 = vmmov %vm2956_vm0  ;;  %v1245_v41 = vld [vmem:[#allocation2 + $0x28] sm:$0xff]  ;;  %911 = vrot.lane.b32.xlu1 %v685_v17, %s2309_s13  ;;  %v1257_v34 = vpack.c.bf16 %v1243_v38, %v1241_v32  ;;  %v888_v54 = vsel %vm2975_vm9, %v864_v31, 0.0  ;;  %v2275_v32 = vld [vmem:[%s2915_s6 + $0xd8] sm:$0xff]  }
 0x10a   : > { %v858_v37 = vsel %vm2964_vm12, %v853_v29, %v854_v43  ;;  %vm2965_vm5 = vmmov %vm2956_vm0  ;;  %v832_v40 = vsel %vm2625_vm15, %v815_v35, 0.0  ;;  %v1291_v49 = vpack.c.bf16 %v1245_v41, %v1243_v38  ;;  %v1247_v59 = vld [vmem:[#allocation2 + $0x38] sm:$0xff]  ;;  %v2281_v38 = vld [vmem:[%s2915_s6 + $0x108] sm:$0xff]  }
 0x10b   : > { %v859_v39 = vsel %vm2965_vm5, %v852_v12, %v853_v29  ;;  %vm2966_vm0 = vmmov %vm2963_vm4  ;;  %v2767_v62 = vpack.c.bf16 %v1247_v59, %v1245_v41  ;;  %v2272_v12 = vld [vmem:[%s2915_s6 + $0xf0] sm:$0xff]   ;;  %v2274_v29 = vld [vmem:[%s2915_s6 + $0xe0] sm:$0xff]  }
 0x10c   : > { %v811_v21 = vsel %vm2966_vm0, %v802_v45, %v803_v11  ;;  %v885_v44 = vsel %vm2637_vm3, %v859_v39, 0.0  ;;  %vm2967_vm13 = vmmov %vm2966_vm0  ;;  %vm2972_vm3 = vnez %v2946_v1  ;;  %v2278_v39 = vld [vmem:[%s2915_s6 + $0xc0] sm:$0xff]  }
 0x10d   : > { %v836_v33 = vsel %vm2633_vm2, %v811_v21, 0.0  ;;  %v809_v46 = vsel %vm2967_vm13, %v804_v24, %v805_v0  ;;  %vm2968_vm15 = vmmov %vm2959_vm8  ;;  %v2280_v21 = vld [vmem:[%s2915_s6 + $0x110] sm:$0xff]   ;;  %v2282_v41 = vld [vmem:[%s2915_s6 + $0x100] sm:$0xff]  }
 0x10e   : > { %939 = vst.msk [vmem:[#allocation2 + $0x58] sm:$0xff] %vm2968_vm15, %v885_v44  ;;  %v838_v45 = vsel %vm2969_vm11, %v809_v46, 0.0  ;;  %vm2970_vm7 = vmmov %vm2959_vm8  ;;  %vm2973_vm8 = vnez %v2948_v2 }
 0x10f   : > { %943 = vst.msk [vmem:[#allocation2 + $0x78] sm:$0xff] %vm2970_vm7, %v887_v48  ;;  %vm2971_vm2 = vmmov %vm2966_vm0  ;;  %v886_v52 = vsel %vm2973_vm8, %v858_v37, 0.0  ;;  %v2277_v37 = vld [vmem:[%s2915_s6 + $0xc8] sm:$0xff]  }
 0x110   : > { %v810_v50 = vsel %vm2971_vm2, %v803_v11, %v804_v24  ;;  %vm2974_vm6 = vmmov %vm2966_vm0 }
 0x111   : > { %v837_v51 = vsel %vm2972_vm3, %v810_v50, 0.0  ;;  %v808_v53 = vsel %vm2974_vm6, %v805_v0, %v806_v25  ;;  %vm2976_vm14 = vmmov %vm2970_vm7  ;;  %v1249_v0 = vld [vmem:[#allocation2 + $0x48] sm:$0xff] }
 0x112   : > { %2107 = vmatprep.mubr.msk.bf16.mxu1 %vm2976_vm14, %v1291_v49  ;;  %vm2977_vm10 = vmmov %vm2970_vm7  ;;  %v839_v55 = vsel %vm2677_vm1, %v808_v53, 0.0  ;;  %v1293_v7 = vpack.c.bf16 %v1249_v0, %v1247_v59 }
 0x113   : > { %2123 = vmatprep.mubr.msk.bf16.mxu0 %vm2977_vm10, %v1257_v34  ;;  %vm2978_vm4 = vmmov %vm2970_vm7 }
 0x114   : > { %941 = vst.msk [vmem:[#allocation2 + $0x68] sm:$0xff] %vm2978_vm4, %v886_v52  ;;  %vm2979_vm12 = vmmov %vm2978_vm4 }
 0x115   : > { %945 = vst.msk [vmem:[#allocation2 + $0x88] sm:$0xff] %vm2979_vm12, %v888_v54  ;;  %vm2980_vm5 = vmmov %vm2978_vm4  ;;  %v1251_v9 = vld [vmem:[#allocation2 + $0x58] sm:$0xff] }
 0x116   : > { %vm2981_vm0 = vmmov %vm2978_vm4  ;;  %v1261_v14 = vpack.c.bf16 %v1251_v9, %v1249_v0 }
 0x117   : > { %vm2982_vm13 = vmmov %vm2981_vm0 }
 0x118   : > { %vm2983_vm1 = vmmov %vm2981_vm0 }
 0x119   : > { %vm2984_vm15 = vmmov %vm2981_vm0 }
 0x11a   : > { %vm2985_vm11 = vmmov %vm2981_vm0 }
 0x11b   : > { %vm2986_vm7 = vmmov %vm2981_vm0  ;;  %v1253_v16 = vld [vmem:[#allocation2 + $0x68] sm:$0xff] }
 0x11c   : > { %vm2987_vm2 = vmmov %vm2981_vm0  ;;  %v1295_v26 = vpack.c.bf16 %v1253_v16, %v1251_v9  ;;  %v1289_v31 = vld [vmem:[#allocation2 + $0x88] sm:$0xff] }
 0x11d   : > { %vm2988_vm3 = vmmov %vm2981_vm0 }
 0x11e   : > { %vm2989_vm8 = vmmov %vm2981_vm0 }
 0x11f   : > { %vm2990_vm6 = vmmov %vm2981_vm0 }
 0x120   : > { %vm2991_vm9 = vmmov %vm2981_vm0 }
 0x121   : > { %vm2992_vm14 = vmmov %vm2981_vm0 }
 0x122   : > { %vm2993_vm10 = vmmov %vm2981_vm0 }
 0x123   : > { %vm2994_vm4 = vmmov %vm2981_vm0 }
 0x124   : > { %vm2995_vm12 = vmmov %vm2981_vm0 }
 0x167   : > { %v902_v56 = vpop.permute.xlu1 %901 }
 0x168   : > { %v924_v57 = vsel %vm2980_vm5, %v834_v18, %v902_v56  ;;  %vm2996_vm5 = vmmov %vm2981_vm0 }
 0x16a   : > { %v898_v58 = vpop.permute.xlu0 %897 }
 0x16b   : > { %v922_v42 = vsel %vm2981_vm0, %v832_v40, %v898_v58  ;;  %v904_v60 = vpop.permute.xlu1 %903  ;;  %v2279_v40 = vld [vmem:[%s2915_s6 + $0x118] sm:$0xff]  }
 0x16c   : > { %v1256_v61 = vpack.c.bf16 %v922_v42, %v2307_v20  ;;  %v925_v63 = vsel %vm2982_vm13, %v835_v10, %v904_v60  ;;  %v1255_v10 = vld [vmem:[#allocation2 + $0x78] sm:$0xff] }
 0x16d   : > { %v1292_v1 = vpack.c.bf16 %v925_v63, %v924_v57  ;;  %v1263_v30 = vpack.c.bf16 %v1255_v10, %v1253_v16  ;;  %v1297_v35 = vpack.c.bf16 %v1289_v31, %v1255_v10  ;;  %v1828_v10 = vld [vmem:[%s2395_s20 + $0x8] sm:$0xff] }
 0x16e   : > { %v900_v43 = vpop.permute.xlu0 %899  ;;  %1589 = vmatmul.mubr.bf16.vlgmr.msra.gmra.mxu0 %v1256_v61 }
 0x16f   : > { %v923_v2 = vsel %vm2983_vm1, %v833_v36, %v900_v43  ;;  %2124 = vmatprep.mubr.msk.bf16.mxu0 %vm2984_vm15, %v2767_v62  ;;  %v2276_v36 = vld [vmem:[%s2915_s6 + $0xd0] sm:$0xff]  }
 0x170   : > { %v1290_v5 = vpack.c.bf16 %v923_v2, %v922_v42  ;;  %v2776_v6 = vpack.c.bf16 %v924_v57, %v923_v2 }
 0x172   : > { %1440 = vmatmul.mubr.bf16.vlgmr.msra.gmra.mxu1 %v1290_v5 }
 0x173   : > { %v906_v8 = vpop.permute.xlu0 %905  ;;  %1755 = vmatpush1.bf16.msra.mxu1 %v2271_v3  ;;  %2108 = vmatprep.mubr.msk.bf16.mxu1 %vm2986_vm7, %v1293_v7 }
 0x174   : > { %v926_v11 = vsel %vm2985_vm11, %v836_v33, %v906_v8  ;;  %1756 = vmatprep.subr.bf16.mxu1 %v2308_v23  ;;  %v1636_v33 = vld [vmem:[#allocation2 + $0x98] sm:$0xff] }
 0x175   : > { %v1260_v13 = vpack.c.bf16 %v926_v11, %v925_v63  ;;  %v1644_v44 = vpack.c.bf16 %v1636_v33, %v1289_v31 }
 0x176   : > { %1597 = vmatmul.mubr.bf16.gmra.mxu0 %v2776_v6 }
 0x177   : > { %v910_v47 = vpop.permute.xlu0 %909  ;;  %v908_v15 = vpop.permute.xlu1 %907  ;;  %1757 = vmatpush1.bf16.msra.mxu1 %v2272_v12  ;;  %2125 = vmatprep.mubr.msk.bf16.mxu0 %vm2989_vm8, %v1261_v14 }
 0x178   : > { %v928_v17 = vsel %vm2987_vm2, %v838_v45, %v910_v47  ;;  %v927_v18 = vsel %vm2988_vm3, %v837_v51, %v908_v15  ;;  %1758 = vmatprep.subr.bf16.mxu1 %v2308_v23  ;;  %v2855_v15 = vld [vmem:[%s2917_s8] ss:$0 sm:$0xff] }
 0x179   : > { %v1294_v22 = vpack.c.bf16 %v927_v18, %v926_v11  ;;  %v1262_v25 = vpack.c.bf16 %v928_v17, %v927_v18 }
 0x17a   : > { %1448 = vmatmul.mubr.bf16.gmra.mxu1 %v1292_v1 }
 0x17b   : > { %v912_v27 = vpop.permute.xlu1 %911  ;;  %1759 = vmatpush1.bf16.msra.mxu1 %v2273_v19  ;;  %2109 = vmatprep.mubr.msk.bf16.mxu1 %vm2991_vm9, %v1295_v26 }
 0x17c   : > { %v929_v24 = vsel %vm2990_vm6, %v839_v55, %v912_v27  ;;  %1760 = vmatprep.subr.bf16.mxu1 %v2308_v23 }
 0x17d   : > { %v1296_v28 = vpack.c.bf16 %v929_v24, %v928_v17  ;;  %v1643_v46 = vpack.c.bf16 %v2307_v20, %v929_v24 }
 0x17e   : > { %1605 = vmatmul.mubr.bf16.gmra.mxu0 %v1260_v13 }
 0x17f   : > { %1761 = vmatpush1.bf16.msra.mxu1 %v2274_v29  ;;  %2126 = vmatprep.mubr.msk.bf16.mxu0 %vm2992_vm14, %v1263_v30 }
 0x180   : > { %1762 = vmatprep.subr.bf16.mxu1 %v2308_v23 }
 0x182   : > { %1456 = vmatmul.mubr.bf16.gmra.mxu1 %v1294_v22 }
 0x183   : > { %1763 = vmatpush1.bf16.msra.mxu1 %v2275_v32  ;;  %2110 = vmatprep.mubr.msk.bf16.mxu1 %vm2993_vm10, %v1297_v35 }
 0x184   : > { %1764 = vmatprep.subr.bf16.mxu1 %v2308_v23 }
 0x186   : > { %1613 = vmatmul.mubr.bf16.gmra.mxu0 %v1262_v25 }
 0x187   : > { %1765 = vmatpush1.bf16.msra.mxu1 %v2276_v36 }
 0x188   : > { %1766 = vmatprep.subr.bf16.mxu1 %v2308_v23 }
 0x18a   : > { %1464 = vmatmul.mubr.bf16.gmra.mxu1 %v1296_v28 }
 0x18b   : > { %1767 = vmatpush1.bf16.msra.mxu1 %v2277_v37  ;;  %2163 = vmatprep.mubr.msk.bf16.mxu1 %vm2994_vm4, %v2767_v62 }
 0x18c   : > { %1768 = vmatprep.subr.bf16.mxu1 %v2308_v23 }
 0x18f   : > { %1769 = vmatpush1.bf16.msra.mxu1 %v2278_v39 }
 0x190   : > { %1778 = vmatprep.subr.bf16.mxu1 %v2308_v23 }
 0x193   : > { %1779 = vmatpush2.bf16.msra.mxu1 %v2279_v40  ;;  %v1829_v40 = vld [vmem:[%s2395_s20 + $0x10] sm:$0xff] }
 0x194   : > { %1780 = vmatprep.subr.bf16.mxu1 %v2308_v23 }
 0x197   : > { %1781 = vmatpush2.bf16.msra.mxu1 %v2280_v21 }
 0x198   : > { %1782 = vmatprep.subr.bf16.mxu1 %v2308_v23 }
 0x19b   : > { %1783 = vmatpush2.bf16.msra.mxu1 %v2281_v38 }
 0x19c   : > { %1784 = vmatprep.subr.bf16.mxu1 %v2308_v23 }
 0x19f   : > { %1785 = vmatpush2.bf16.msra.mxu1 %v2282_v41 }
 0x1a2   : > { %1787 = vmatmul.mubr.bf16.vlgmr.msra.gmra.mxu1 %v2776_v6 }
 0x1a3   : > { %2164 = vmatprep.mubr.msk.bf16.mxu1 %vm2995_vm12, %v1261_v14  ;;  %v2850_v14 = vld [vmem:[%s2916_s7] ss:$0 sm:$0xff] }
 0x1aa   : > { %1795 = vmatmul.mubr.bf16.gmra.mxu1 %v1260_v13 }
 0x1ab   : > { %2165 = vmatprep.mubr.msk.bf16.mxu1 %vm2996_vm5, %v1263_v30 }
 0x1b2   : > { %1803 = vmatmul.mubr.bf16.gmra.mxu1 %v1262_v25 }
 0x1b3   : > { %2166 = vmatprep.mubr.msk.bf16.mxu1 %vm2981_vm0, %v1644_v44 }
 0x1ba   : > { %1811 = vmatmul.mubr.bf16.gmra.mxu1 %v1643_v46 }
 0x22e   : > { %v1590_v48 = vpop.f32.mrf.mxu0 }
 0x230   : > { %v1592_v34 = vpop.f32.mrf.mxu0 }
 0x232   : > { %v1441_v49 = vpop.f32.mrf.mxu1  ;;  %v1593_v23 = vpop.f32.mrf.mxu0 }
 0x233   : > { %v1591_v12 = vadd.f32 %v1590_v48, %v1441_v49 }
 0x234   : > { %v1443_v45 = vpop.f32.mrf.mxu1  ;;  %v1595_v50 = vpop.f32.mrf.mxu0 }
 0x236   : > { %v1444_v51 = vpop.f32.mrf.mxu1  ;;  %v1598_v52 = vpop.f32.mrf.mxu0 }
 0x237   : > { %v1594_v17 = vadd.f32 %v1593_v23, %v1444_v51  ;;  %v1830_v23 = vld [vmem:[%s2395_s20 + $0x18] sm:$0xff] }
 0x238   : > { %v1446_v53 = vpop.f32.mrf.mxu1  ;;  %v1600_v54 = vpop.f32.mrf.mxu0 }
 0x23a   : > { %v1449_v55 = vpop.f32.mrf.mxu1  ;;  %v1601_v56 = vpop.f32.mrf.mxu0 }
 0x23b   : > { %v1599_v27 = vadd.f32 %v1598_v52, %v1449_v55 }
 0x23c   : > { %v1451_v57 = vpop.f32.mrf.mxu1  ;;  %v1603_v58 = vpop.f32.mrf.mxu0 }
 0x23d   : > { %v1831_v58 = vld [vmem:[%s2395_s20 + $0x20] sm:$0xff] }
 0x23e   : > { %v1452_v42 = vpop.f32.mrf.mxu1  ;;  %v1606_v59 = vpop.f32.mrf.mxu0 }
 0x23f   : > { %v1602_v36 = vadd.f32 %v1601_v56, %v1452_v42 }
 0x240   : > { %v1454_v60 = vpop.f32.mrf.mxu1  ;;  %v1608_v61 = vpop.f32.mrf.mxu0 }
 0x242   : > { %v1457_v20 = vpop.f32.mrf.mxu1  ;;  %v1609_v62 = vpop.f32.mrf.mxu0 }
 0x243   : > { %v1607_v46 = vadd.f32 %v1606_v59, %v1457_v20 }
 0x244   : > { %v1459_v63 = vpop.f32.mrf.mxu1  ;;  %v1611_v0 = vpop.f32.mrf.mxu0 }
 0x246   : > { %v1460_v43 = vpop.f32.mrf.mxu1  ;;  %v2839_v1 = vpop.f32.mrf.mxu0 }
 0x247   : > { %v1610_v54 = vadd.f32 %v1609_v62, %v1460_v43 }
 0x248   : > { %v1462_v2 = vpop.f32.mrf.mxu1  ;;  %v1616_v3 = vpop.f32.mrf.mxu0 }
 0x249   : > { %v1832_v2 = vld [vmem:[%s2395_s20 + $0x28] sm:$0xff] }
 0x24a   : > { %v2841_v5 = vpop.f32.mrf.mxu1  ;;  %v2843_v6 = vpop.f32.mrf.mxu0 }
 0x24b   : > { %v1615_v63 = vadd.f32 %v2839_v1, %v2841_v5 }
 0x24c   : > { %v1467_v7 = vpop.f32.mrf.mxu1  ;;  %v1619_v8 = vpop.f32.mrf.mxu0 }
 0x24e   : > { %v2845_v9 = vpop.f32.mrf.mxu1 }
 0x250   : > { %v1470_v11 = vpop.f32.mrf.mxu1 }
 0x262   : > { %v1788_v13 = vpop.f32.mrf.mxu1 }
 0x263   : > { %v1819_v47 = vadd.f32 %v1788_v13, %v1591_v12  ;;  %v1618_v13 = vadd.f32 %v2843_v6, %v2845_v9  ;;  %v1834_v9 = vld [vmem:[%s2395_s20 + $0x38] sm:$0xff] }
 0x264   : > { %v1790_v16 = vpop.f32.mrf.mxu1 }
 0x265   : > { %v1842_v18 = vmul.f32 %v2850_v14, %v1819_v47  ;;  %v1833_v16 = vld [vmem:[%s2395_s20 + $0x30] sm:$0xff] }
 0x266   : > { %v1791_v19 = vpop.f32.mrf.mxu1 }
 0x267   : > { %v1857_v22 = vadd.f32 %v2855_v15, %v1842_v18  ;;  %v1820_v25 = vadd.f32 %v1791_v19, %v1594_v17 }
 0x268   : > { %v1793_v26 = vpop.f32.mrf.mxu1 }
 0x269   : > { %v1865_v24 = vadd.f32 %v1857_v22, %v2401_v4  ;;  %v1843_v29 = vmul.f32 %v2850_v14, %v1820_v25 }
 0x26a   : > { %v1796_v28 = vpop.f32.mrf.mxu1 }
 0x26b   : > { %vm1873_vm13 = vcmp.ge.f32.partialorder %v1865_v24, 0.0  ;;  %v1881_v30 = vmul.f32 0.1, %v1865_v24  ;;  %v1858_v31 = vadd.f32 %v2855_v15, %v1843_v29  ;;  %v1821_v32 = vadd.f32 %v1796_v28, %v1599_v27 }
 0x26c   : > { %v1798_v35 = vpop.f32.mrf.mxu1 }
 0x26d   : > { %v1889_v4 = vsel %vm1873_vm13, %v1865_v24, %v1881_v30  ;;  %v1866_v37 = vadd.f32 %v1858_v31, %v1828_v10  ;;  %v1844_v39 = vmul.f32 %v2850_v14, %v1821_v32 }
 0x26e   : > { %1897 = vst [vmem:[%s2867_s2] sm:$0xff] %v1889_v4  ;;  %v1799_v21 = vpop.f32.mrf.mxu1 }
 0x26f   : > { %vm1874_vm1 = vcmp.ge.f32.partialorder %v1866_v37, 0.0  ;;  %v1882_v38 = vmul.f32 0.1, %v1866_v37  ;;  %v1859_v41 = vadd.f32 %v2855_v15, %v1844_v39  ;;  %v1822_v33 = vadd.f32 %v1799_v21, %v1602_v36 }
 0x270   : > { %v1801_v44 = vpop.f32.mrf.mxu1 }
 0x271   : > { %v1890_v48 = vsel %vm1874_vm1, %v1866_v37, %v1882_v38  ;;  %v1867_v34 = vadd.f32 %v1859_v41, %v1829_v40  ;;  %v1845_v49 = vmul.f32 %v2850_v14, %v1822_v33 }
 0x272   : > { %1898 = vst [vmem:[%s2867_s2 + $0x8] sm:$0xff] %v1890_v48  ;;  %v1804_v45 = vpop.f32.mrf.mxu1 }
 0x273   : > { %vm1875_vm15 = vcmp.ge.f32.partialorder %v1867_v34, 0.0  ;;  %v1883_v50 = vmul.f32 0.1, %v1867_v34  ;;  %v1860_v51 = vadd.f32 %v2855_v15, %v1845_v49  ;;  %v1823_v52 = vadd.f32 %v1804_v45, %v1607_v46 }
 0x274   : > { %v1806_v53 = vpop.f32.mrf.mxu1 }
 0x275   : > { %v1891_v55 = vsel %vm1875_vm15, %v1867_v34, %v1883_v50  ;;  %v1868_v56 = vadd.f32 %v1860_v51, %v1830_v23  ;;  %v1846_v57 = vmul.f32 %v2850_v14, %v1823_v52 }
 0x276   : > { %1899 = vst [vmem:[%s2867_s2 + $0x10] sm:$0xff] %v1891_v55  ;;  %v1807_v42 = vpop.f32.mrf.mxu1 }
 0x277   : > { %vm1876_vm11 = vcmp.ge.f32.partialorder %v1868_v56, 0.0  ;;  %v1884_v59 = vmul.f32 0.1, %v1868_v56  ;;  %v1861_v60 = vadd.f32 %v2855_v15, %v1846_v57  ;;  %v1824_v61 = vadd.f32 %v1807_v42, %v1610_v54 }
 0x278   : > { %v1809_v20 = vpop.f32.mrf.mxu1 }
 0x279   : > { %v1892_v62 = vsel %vm1876_vm11, %v1868_v56, %v1884_v59  ;;  %v1869_v0 = vadd.f32 %v1861_v60, %v1831_v58  ;;  %v1847_v43 = vmul.f32 %v2850_v14, %v1824_v61 }
 0x27a   : > { %1900 = vst [vmem:[%s2867_s2 + $0x18] sm:$0xff] %v1892_v62  ;;  %v1812_v3 = vpop.f32.mrf.mxu1 }
 0x27b   : > { %vm1877_vm7 = vcmp.ge.f32.partialorder %v1869_v0, 0.0  ;;  %v1885_v7 = vmul.f32 0.1, %v1869_v0  ;;  %v1862_v8 = vadd.f32 %v2855_v15, %v1847_v43  ;;  %v1825_v11 = vadd.f32 %v1812_v3, %v1615_v63 }
 0x27c   : > { %v1814_v12 = vpop.f32.mrf.mxu1 }
 0x27d   : > { %v1893_v1 = vsel %vm1877_vm7, %v1869_v0, %v1885_v7  ;;  %v1870_v5 = vadd.f32 %v1862_v8, %v1832_v2  ;;  %v1848_v47 = vmul.f32 %v2850_v14, %v1825_v11 }
 0x27e   : > { %1901 = vst [vmem:[%s2867_s2 + $0x20] sm:$0xff] %v1893_v1  ;;  %v1815_v17 = vpop.f32.mrf.mxu1 }
 0x27f   : > { %vm1878_vm2 = vcmp.ge.f32.partialorder %v1870_v5, 0.0  ;;  %v1886_v18 = vmul.f32 0.1, %v1870_v5  ;;  %v1863_v19 = vadd.f32 %v2855_v15, %v1848_v47  ;;  %v1826_v22 = vadd.f32 %v1815_v17, %v1618_v13 }
 0x280   : > { %v1817_v25 = vpop.f32.mrf.mxu1 }
 0x281   : > { %v1894_v26 = vsel %vm1878_vm2, %v1870_v5, %v1886_v18  ;;  %v1871_v27 = vadd.f32 %v1863_v19, %v1833_v16  ;;  %v1849_v6 = vmul.f32 %v2850_v14, %v1826_v22 }
 0x282   : > { %1902 = vst [vmem:[%s2867_s2 + $0x28] sm:$0xff] %v1894_v26 }
 0x283   : > { %vm1879_vm3 = vcmp.ge.f32.partialorder %v1871_v27, 0.0  ;;  %v1887_v24 = vmul.f32 0.1, %v1871_v27  ;;  %v1864_v29 = vadd.f32 %v2855_v15, %v1849_v6 }
 0x285   : > { %v1895_v10 = vsel %vm1879_vm3, %v1871_v27, %v1887_v24  ;;  %v1872_v28 = vadd.f32 %v1864_v29, %v1834_v9 }
 0x286   : > { %1903 = vst [vmem:[%s2867_s2 + $0x30] sm:$0xff] %v1895_v10 }
 0x287   : > { %vm1880_vm8 = vcmp.ge.f32.partialorder %v1872_v28, 0.0  ;;  %v1888_v30 = vmul.f32 0.1, %v1872_v28 }
 0x289   : > { %v1896_v31 = vsel %vm1880_vm8, %v1872_v28, %v1888_v30 }
 0x28a   : > { %1904 = vst [vmem:[%s2867_s2 + $0x38] sm:$0xff] %v1896_v31 }
 0x28b PF: > { %s19_s30 = sadd.s32 1, %s2305_s30   ;;  %s2997_s28 = smov %s2301_s29 }
 0x28c   : > { %p16_p5 = scmp.ge.s32.totalorder %s19_s30, 4   ;;  %s2998_s29 = smov %s3000_s10 }
 0x28e   :  { %18 = sbr.rel (!%p16_p5) target bundleno = 2 (0x2), region = 110 }

</bundles_post_ra>
